<compile_context>
chip_gen: v7x
topology: tpu7x:2x2x1
jax: 0.10.0
libtpu: 0.0.40
codegen_flags: <defaults>
</compile_context>

<pallas_src>
import jax
import jax.numpy as jnp
from jax.experimental import pallas as pl
from jax.experimental.pallas import tpu as pltpu

INPUT_SIZE = 14
HIDDEN = 128
MAX_TILE_T = 128   # timesteps per grid step (amortizes ~0.35us grid overhead)


def lstm_recurrence_kernel(xproj_ref, whh_ref, wlin_ref, y_ref, h_state, c_state):
    """One grid step = one chunk of tile_t timesteps.

    xproj_ref : (tile_t, B, 4H) f32   precomputed x_t @ W_ih^T + b_ih + b_hh
                                      (gate order permuted to i, f, o, g)
    whh_ref   : (H, 4H) bf16          recurrent weight (transposed, permuted)
    wlin_ref  : (1, H)  f32           linear-head row (fused 128->1 head)
    y_ref     : (1, B, tile_t) f32    head output for every step of the chunk
    h_state   : (B, H) VMEM f32       h carried across chunks
    c_state   : (B, H) VMEM f32       c carried across chunks
    """
    tile_t = xproj_ref.shape[0]
    b = xproj_ref.shape[1]

    # Zero-init the recurrent state on the very first chunk only.
    @pl.when(pl.program_id(0) == 0)
    def _():
        h_state[...] = jnp.zeros_like(h_state)
        c_state[...] = jnp.zeros_like(c_state)

    # Tiny loop-invariant values hoisted once per chunk (1 vreg each).
    wlin = wlin_ref[...]                                          # (1, H)
    lane_iota = jax.lax.broadcasted_iota(jnp.int32, (b, tile_t), 1)

    def step(i, carry):
        h_prev, c_prev, y_acc = carry                             # (B,H),(B,H),(B,tile_t)

        # gates = xproj[t] + h_{t-1} @ W_hh^T  (bf16 operands, f32 accumulation).
        # whh_ref is indexed inside the dot (no persistent vreg hoist).
        gates = xproj_ref[i] + jnp.dot(
            h_prev.astype(jnp.bfloat16), whh_ref[...],
            preferred_element_type=jnp.float32)                   # (B, 4H) f32

        # Permuted gate order (i, f, o, g): one tanh-form sigmoid over the
        # three sigmoid gates (contiguous lanes 0:3H), one tanh for g.
        sig = 0.5 * jnp.tanh(0.5 * gates[:, :3 * HIDDEN]) + 0.5
        i_g = sig[:, 0 * HIDDEN:1 * HIDDEN]
        f_g = sig[:, 1 * HIDDEN:2 * HIDDEN]
        o_g = sig[:, 2 * HIDDEN:3 * HIDDEN]
        g_g = jnp.tanh(gates[:, 3 * HIDDEN:4 * HIDDEN])

        c_new = f_g * c_prev + i_g * g_g
        h_new = o_g * jnp.tanh(c_new)

        # Fused 128->1 head: VPU multiply + XLU lane reduce; nothing in the
        # recurrence depends on it, so it overlaps with the next step.
        y_col = jnp.sum(h_new * wlin, axis=-1, keepdims=True)     # (B, 1)
        y_acc = jnp.where(lane_iota == i, y_col, y_acc)           # (B, tile_t)
        return h_new, c_new, y_acc

    y0 = jnp.zeros((b, tile_t), jnp.float32)
    h_fin, c_fin, y_chunk = jax.lax.fori_loop(
        0, tile_t, step, (h_state[...], c_state[...], y0),
        unroll=min(16, tile_t))

    # One lane-dense writeback per chunk; persist state for the next chunk.
    # NOTE: padded tail steps (zero xproj) still update h/c state; harmless
    # because only the discarded padded y columns depend on them and the
    # kernel never returns final (h, c).
    y_ref[0] = y_chunk
    h_state[...] = h_fin
    c_state[...] = c_fin


def _permute_gates(a):
    """Reorder PyTorch gate blocks (i, f, g, o) -> (i, f, o, g) along axis 0."""
    gi, gf, gg, go = jnp.split(a, 4, axis=0)
    return jnp.concatenate([gi, gf, go, gg], axis=0)


def market_lstm_forward(x, params, *, max_tile_t=MAX_TILE_T):
    """x: (B, T, 14) float32  ->  (B, T, 1) float32 (same as the PyTorch module)."""
    B, T, F = x.shape
    assert F == INPUT_SIZE

    # Offline param prep: gate permutation, transposes, bf16 recurrent weight.
    wih_t = _permute_gates(params["w_ih"]).T                       # (F, 4H) f32
    whh_t = _permute_gates(params["w_hh"]).T.astype(jnp.bfloat16)  # (H, 4H) bf16
    bias = _permute_gates(params["b_ih"] + params["b_hh"])         # (4H,)  f32
    wlin = params["w_lin"].astype(jnp.float32)                     # (1, H)
    blin = params["b_lin"]                                         # (1,)

    # Parallel input projection for ALL timesteps (one full-size XLA GEMM),
    # emitted time-major; biases folded in so they vanish from the serial loop.
    xproj = jnp.einsum("btf,fg->tbg", x, wih_t) + bias             # (T, B, 4H) f32

    # Chunk the time axis; pad the tail so every chunk is full.
    if T <= max_tile_t:
        num_chunks, tile_t = 1, T
    else:
        tile_t = max_tile_t
        num_chunks = -(-T // tile_t)
    t_pad = num_chunks * tile_t
    if t_pad != T:
        xproj = jnp.pad(xproj, ((0, t_pad - T), (0, 0), (0, 0)))

    y = pl.pallas_call(
        lstm_recurrence_kernel,
        out_shape=jax.ShapeDtypeStruct((num_chunks, B, tile_t), jnp.float32),
        grid_spec=pltpu.PrefetchScalarGridSpec(
            num_scalar_prefetch=0,
            grid=(num_chunks,),
            in_specs=[
                pl.BlockSpec((tile_t, B, 4 * HIDDEN), lambda c: (c, 0, 0)),  # xproj chunk
                pl.BlockSpec((HIDDEN, 4 * HIDDEN), lambda c: (0, 0)),        # W_hh^T (bf16)
                pl.BlockSpec((1, HIDDEN), lambda c: (0, 0)),                 # w_lin row
            ],
            out_specs=pl.BlockSpec((1, B, tile_t), lambda c: (c, 0, 0)),
            scratch_shapes=[
                pltpu.VMEM((B, HIDDEN), jnp.float32),    # h carried across chunks
                pltpu.VMEM((B, HIDDEN), jnp.float32),    # c carried across chunks
            ],
        ),
        compiler_params=pltpu.CompilerParams(
            # Sequential recurrence across chunks.  (With larger independent
            # batches a leading "parallel" batch axis could engage the second
            # TensorCore on v7x; at B=2 it is not worthwhile.)
            dimension_semantics=("arbitrary",)),
    )(xproj, whh_t, wlin)

    # y: (num_chunks, B, tile_t) -> (B, T, 1).  Only a tiny (B, T) array is
    # reshaped here (the full hidden sequence never leaves the kernel).
    y = jnp.transpose(y, (1, 0, 2)).reshape(B, t_pad)[:, :T]
    return y[..., None] + blin


def init_params(key):
    """Deterministic synthetic params matching PyTorch shapes/init scale."""
    k = 1.0 / jnp.sqrt(jnp.float32(HIDDEN))
    ks = jax.random.split(key, 6)
    return {
        "w_ih": jax.random.uniform(ks[0], (4 * HIDDEN, INPUT_SIZE), jnp.float32, -k, k),
        "w_hh": jax.random.uniform(ks[1], (4 * HIDDEN, HIDDEN), jnp.float32, -k, k),
        "b_ih": jax.random.uniform(ks[2], (4 * HIDDEN,), jnp.float32, -k, k),
        "b_hh": jax.random.uniform(ks[3], (4 * HIDDEN,), jnp.float32, -k, k),
        "w_lin": jax.random.uniform(ks[4], (1, HIDDEN), jnp.float32, -k, k),
        "b_lin": jax.random.uniform(ks[5], (1,), jnp.float32, -k, k),
    }


def reference_forward(x, params):
    """Pure-JAX f32 reference (lax.scan LSTM + linear), PyTorch gate order."""
    wih_t = params["w_ih"].T
    whh_t = params["w_hh"].T
    b = params["b_ih"] + params["b_hh"]
    B = x.shape[0]

    def step(carry, x_t):
        h, c = carry
        gates = x_t @ wih_t + h @ whh_t + b
        i = jax.nn.sigmoid(gates[:, 0 * HIDDEN:1 * HIDDEN])
        f = jax.nn.sigmoid(gates[:, 1 * HIDDEN:2 * HIDDEN])
        g = jnp.tanh(gates[:, 2 * HIDDEN:3 * HIDDEN])
        o = jax.nn.sigmoid(gates[:, 3 * HIDDEN:4 * HIDDEN])
        c = f * c + i * g
        h = o * jnp.tanh(c)
        return (h, c), h

    h0 = jnp.zeros((B, HIDDEN), jnp.float32)
    c0 = jnp.zeros((B, HIDDEN), jnp.float32)
    _, hs = jax.lax.scan(step, (h0, c0), jnp.transpose(x, (1, 0, 2)))
    hs = jnp.transpose(hs, (1, 0, 2))                    # (B, T, H)
    return hs @ params["w_lin"].T + params["b_lin"]      # (B, T, 1)


if __name__ == "__main__":
    key = jax.random.PRNGKey(0)
    k_x, k_p = jax.random.split(key)

    B, T = 2, 8
    x = jax.random.normal(k_x, (B, T, INPUT_SIZE), jnp.float32)
    params = init_params(k_p)

    fwd = jax.jit(lambda xx: market_lstm_forward(xx, params))
    y = jax.block_until_ready(fwd(x))

    y_ref = jax.block_until_ready(reference_forward(x, params))
    assert y.shape == (B, T, 1), y.shape
    # bf16 recurrent-matmul operands (f32 accumulation) -> slightly looser
    # tolerance vs the pure-f32 reference.
    assert jnp.allclose(y, y_ref, atol=5e-3, rtol=5e-3), float(jnp.max(jnp.abs(y - y_ref)))

    print("KERNEL_OK")
</pallas_src>

<mosaic_0001>
module attributes {stable_mosaic.version = 11 : i64} {
  func.func @lstm_recurrence_kernel(%arg0: i32, %arg1: memref<8x2x512xf32, #tpu.memory_space<vmem>>, %arg2: memref<128x512xbf16, #tpu.memory_space<vmem>>, %arg3: memref<1x128xf32, #tpu.memory_space<vmem>>, %arg4: memref<1x2x8xf32, #tpu.memory_space<vmem>>, %arg5: memref<2x128xf32, #tpu.memory_space<vmem>>, %arg6: memref<2x128xf32, #tpu.memory_space<vmem>>) attributes {dimension_semantics = [#tpu.dimension_semantics<arbitrary>], iteration_bounds = array<i64: 1>, scalar_prefetch = 0 : i64, scratch_operands = 2 : i64, tpu.core_type = #tpu.core_type<tc>, window_params = [{transform_indices = @transform_0, window_bounds = array<i64: 8, 2, 512>}, {pipeline_mode = #tpu.pipeline_mode<synchronous>, transform_indices = @transform_1, window_bounds = array<i64: 128, 512>}, {pipeline_mode = #tpu.pipeline_mode<synchronous>, transform_indices = @transform_2, window_bounds = array<i64: 1, 128>}, {transform_indices = @transform_3, window_bounds = array<i64: 1, 2, 8>}]} {
    %c0_i32 = arith.constant 0 : i32
    %0 = arith.cmpi eq, %arg0, %c0_i32 : i32
    %1 = arith.extui %0 : i1 to i32
    %c0_i32_0 = arith.constant 0 : i32
    %2 = arith.cmpi ne, %1, %c0_i32_0 : i32
    scf.if %2 {
      %cst_86 = arith.constant 0.000000e+00 : f32
      %285 = vector.broadcast %cst_86 : f32 to vector<2x128xf32>
      %c0_87 = arith.constant 0 : index
      %c0_88 = arith.constant 0 : index
      %286 = vector.load %arg5[%c0_87, %c0_88] : memref<2x128xf32, #tpu.memory_space<vmem>>, vector<2x128xf32>
      tpu.vector_store %arg5[%c0_87, %c0_88], %285 {strides = array<i32>} : memref<2x128xf32, #tpu.memory_space<vmem>>, vector<2x128xf32>,
      %cst_89 = arith.constant 0.000000e+00 : f32
      %287 = vector.broadcast %cst_89 : f32 to vector<2x128xf32>
      %c0_90 = arith.constant 0 : index
      %c0_91 = arith.constant 0 : index
      %288 = vector.load %arg6[%c0_90, %c0_91] : memref<2x128xf32, #tpu.memory_space<vmem>>, vector<2x128xf32>
      tpu.vector_store %arg6[%c0_90, %c0_91], %287 {strides = array<i32>} : memref<2x128xf32, #tpu.memory_space<vmem>>, vector<2x128xf32>,
    } else {
    }
    %c0 = arith.constant 0 : index
    %c0_1 = arith.constant 0 : index
    %3 = vector.load %arg3[%c0, %c0_1] : memref<1x128xf32, #tpu.memory_space<vmem>>, vector<1x128xf32>
    %4 = tpu.iota {dimensions = array<i32: 1>} : vector<2x8xi32>
    %cst = arith.constant 0.000000e+00 : f32
    %5 = vector.broadcast %cst : f32 to vector<2x8xf32>
    %c0_2 = arith.constant 0 : index
    %c0_3 = arith.constant 0 : index
    %6 = vector.load %arg5[%c0_2, %c0_3] : memref<2x128xf32, #tpu.memory_space<vmem>>, vector<2x128xf32>
    %c0_4 = arith.constant 0 : index
    %c0_5 = arith.constant 0 : index
    %7 = vector.load %arg6[%c0_4, %c0_5] : memref<2x128xf32, #tpu.memory_space<vmem>>, vector<2x128xf32>
    %c0_i32_6 = arith.constant 0 : i32
    %8 = arith.index_cast %c0_i32_6 : i32 to index
    %c0_7 = arith.constant 0 : index
    %c0_8 = arith.constant 0 : index
    %9 = vector.load %arg1[%8, %c0_7, %c0_8] : memref<8x2x512xf32, #tpu.memory_space<vmem>>, vector<1x2x512xf32>
    %10 = vector.shape_cast %9 : vector<1x2x512xf32> to vector<2x512xf32>
    %11 = arith.truncf %6 : vector<2x128xf32> to vector<2x128xbf16>
    %c0_9 = arith.constant 0 : index
    %c0_10 = arith.constant 0 : index
    %12 = vector.load %arg2[%c0_9, %c0_10] : memref<128x512xbf16, #tpu.memory_space<vmem>>, vector<128x512xbf16>
    %cst_11 = arith.constant dense<0.000000e+00> : vector<2x512xf32>
    %13 = tpu.matmul %11, %12, %cst_11 {dimension_numbers = #tpu.dot_dimension_numbers<[1], [0], [0], [1], [0, 0, 1, 1], [], []>} : vector<2x128xbf16>, vector<128x512xbf16>, vector<2x512xf32> -> vector<2x512xf32>
    %14 = arith.addf %10, %13 : vector<2x512xf32>
    %15 = vector.extract_strided_slice %14 {offsets = [0, 0], sizes = [2, 384], strides = [1, 1]} : vector<2x512xf32> to vector<2x384xf32>
    %cst_12 = arith.constant 5.000000e-01 : f32
    %16 = vector.broadcast %cst_12 : f32 to vector<2x384xf32>
    %17 = arith.mulf %16, %15 : vector<2x384xf32>
    %18 = math.tanh %17 : vector<2x384xf32>
    %cst_13 = arith.constant 5.000000e-01 : f32
    %19 = vector.broadcast %cst_13 : f32 to vector<2x384xf32>
    %20 = arith.mulf %19, %18 : vector<2x384xf32>
    %cst_14 = arith.constant 5.000000e-01 : f32
    %21 = vector.broadcast %cst_14 : f32 to vector<2x384xf32>
    %22 = arith.addf %20, %21 : vector<2x384xf32>
    %23 = vector.extract_strided_slice %22 {offsets = [0, 0], sizes = [2, 128], strides = [1, 1]} : vector<2x384xf32> to vector<2x128xf32>
    %24 = vector.extract_strided_slice %22 {offsets = [0, 128], sizes = [2, 128], strides = [1, 1]} : vector<2x384xf32> to vector<2x128xf32>
    %25 = vector.extract_strided_slice %22 {offsets = [0, 256], sizes = [2, 128], strides = [1, 1]} : vector<2x384xf32> to vector<2x128xf32>
    %26 = vector.extract_strided_slice %14 {offsets = [0, 384], sizes = [2, 128], strides = [1, 1]} : vector<2x512xf32> to vector<2x128xf32>
    %27 = math.tanh %26 : vector<2x128xf32>
    %28 = arith.mulf %24, %7 : vector<2x128xf32>
    %29 = arith.mulf %23, %27 : vector<2x128xf32>
    %30 = arith.addf %28, %29 : vector<2x128xf32>
    %31 = math.tanh %30 : vector<2x128xf32>
    %32 = arith.mulf %25, %31 : vector<2x128xf32>
    %33 = vector.broadcast %3 : vector<1x128xf32> to vector<2x128xf32>
    %34 = arith.mulf %32, %33 : vector<2x128xf32>
    %cst_15 = arith.constant dense<0.000000e+00> : vector<2xf32>
    %35 = vector.multi_reduction <add>, %34, %cst_15 [1] : vector<2x128xf32> to vector<2xf32>
    %36 = vector.shape_cast %35 : vector<2xf32> to vector<2x1xf32>
    %37 = vector.broadcast %c0_i32_6 : i32 to vector<2x8xi32>
    %38 = arith.cmpi eq, %4, %37 : vector<2x8xi32>
    %39 = vector.shape_cast %36 : vector<2x1xf32> to vector<2x1xf32>
    %40 = vector.broadcast %39 : vector<2x1xf32> to vector<2x8xf32>
    %41 = arith.select %38, %40, %5 : vector<2x8xi1>, vector<2x8xf32>
    %c1_i32 = arith.constant 1 : i32
    %42 = arith.index_cast %c1_i32 : i32 to index
    %c0_16 = arith.constant 0 : index
    %c0_17 = arith.constant 0 : index
    %43 = vector.load %arg1[%42, %c0_16, %c0_17] : memref<8x2x512xf32, #tpu.memory_space<vmem>>, vector<1x2x512xf32>
    %44 = vector.shape_cast %43 : vector<1x2x512xf32> to vector<2x512xf32>
    %45 = arith.truncf %32 : vector<2x128xf32> to vector<2x128xbf16>
    %c0_18 = arith.constant 0 : index
    %c0_19 = arith.constant 0 : index
    %46 = vector.load %arg2[%c0_18, %c0_19] : memref<128x512xbf16, #tpu.memory_space<vmem>>, vector<128x512xbf16>
    %cst_20 = arith.constant dense<0.000000e+00> : vector<2x512xf32>
    %47 = tpu.matmul %45, %46, %cst_20 {dimension_numbers = #tpu.dot_dimension_numbers<[1], [0], [0], [1], [0, 0, 1, 1], [], []>} : vector<2x128xbf16>, vector<128x512xbf16>, vector<2x512xf32> -> vector<2x512xf32>
    %48 = arith.addf %44, %47 : vector<2x512xf32>
    %49 = vector.extract_strided_slice %48 {offsets = [0, 0], sizes = [2, 384], strides = [1, 1]} : vector<2x512xf32> to vector<2x384xf32>
    %cst_21 = arith.constant 5.000000e-01 : f32
    %50 = vector.broadcast %cst_21 : f32 to vector<2x384xf32>
    %51 = arith.mulf %50, %49 : vector<2x384xf32>
    %52 = math.tanh %51 : vector<2x384xf32>
    %cst_22 = arith.constant 5.000000e-01 : f32
    %53 = vector.broadcast %cst_22 : f32 to vector<2x384xf32>
    %54 = arith.mulf %53, %52 : vector<2x384xf32>
    %cst_23 = arith.constant 5.000000e-01 : f32
    %55 = vector.broadcast %cst_23 : f32 to vector<2x384xf32>
    %56 = arith.addf %54, %55 : vector<2x384xf32>
    %57 = vector.extract_strided_slice %56 {offsets = [0, 0], sizes = [2, 128], strides = [1, 1]} : vector<2x384xf32> to vector<2x128xf32>
    %58 = vector.extract_strided_slice %56 {offsets = [0, 128], sizes = [2, 128], strides = [1, 1]} : vector<2x384xf32> to vector<2x128xf32>
    %59 = vector.extract_strided_slice %56 {offsets = [0, 256], sizes = [2, 128], strides = [1, 1]} : vector<2x384xf32> to vector<2x128xf32>
    %60 = vector.extract_strided_slice %48 {offsets = [0, 384], sizes = [2, 128], strides = [1, 1]} : vector<2x512xf32> to vector<2x128xf32>
    %61 = math.tanh %60 : vector<2x128xf32>
    %62 = arith.mulf %58, %30 : vector<2x128xf32>
    %63 = arith.mulf %57, %61 : vector<2x128xf32>
    %64 = arith.addf %62, %63 : vector<2x128xf32>
    %65 = math.tanh %64 : vector<2x128xf32>
    %66 = arith.mulf %59, %65 : vector<2x128xf32>
    %67 = vector.broadcast %3 : vector<1x128xf32> to vector<2x128xf32>
    %68 = arith.mulf %66, %67 : vector<2x128xf32>
    %cst_24 = arith.constant dense<0.000000e+00> : vector<2xf32>
    %69 = vector.multi_reduction <add>, %68, %cst_24 [1] : vector<2x128xf32> to vector<2xf32>
    %70 = vector.shape_cast %69 : vector<2xf32> to vector<2x1xf32>
    %71 = vector.broadcast %c1_i32 : i32 to vector<2x8xi32>
    %72 = arith.cmpi eq, %4, %71 : vector<2x8xi32>
    %73 = vector.shape_cast %70 : vector<2x1xf32> to vector<2x1xf32>
    %74 = vector.broadcast %73 : vector<2x1xf32> to vector<2x8xf32>
    %75 = arith.select %72, %74, %41 : vector<2x8xi1>, vector<2x8xf32>
    %c2_i32 = arith.constant 2 : i32
    %76 = arith.index_cast %c2_i32 : i32 to index
    %c0_25 = arith.constant 0 : index
    %c0_26 = arith.constant 0 : index
    %77 = vector.load %arg1[%76, %c0_25, %c0_26] : memref<8x2x512xf32, #tpu.memory_space<vmem>>, vector<1x2x512xf32>
    %78 = vector.shape_cast %77 : vector<1x2x512xf32> to vector<2x512xf32>
    %79 = arith.truncf %66 : vector<2x128xf32> to vector<2x128xbf16>
    %c0_27 = arith.constant 0 : index
    %c0_28 = arith.constant 0 : index
    %80 = vector.load %arg2[%c0_27, %c0_28] : memref<128x512xbf16, #tpu.memory_space<vmem>>, vector<128x512xbf16>
    %cst_29 = arith.constant dense<0.000000e+00> : vector<2x512xf32>
    %81 = tpu.matmul %79, %80, %cst_29 {dimension_numbers = #tpu.dot_dimension_numbers<[1], [0], [0], [1], [0, 0, 1, 1], [], []>} : vector<2x128xbf16>, vector<128x512xbf16>, vector<2x512xf32> -> vector<2x512xf32>
    %82 = arith.addf %78, %81 : vector<2x512xf32>
    %83 = vector.extract_strided_slice %82 {offsets = [0, 0], sizes = [2, 384], strides = [1, 1]} : vector<2x512xf32> to vector<2x384xf32>
    %cst_30 = arith.constant 5.000000e-01 : f32
    %84 = vector.broadcast %cst_30 : f32 to vector<2x384xf32>
    %85 = arith.mulf %84, %83 : vector<2x384xf32>
    %86 = math.tanh %85 : vector<2x384xf32>
    %cst_31 = arith.constant 5.000000e-01 : f32
    %87 = vector.broadcast %cst_31 : f32 to vector<2x384xf32>
    %88 = arith.mulf %87, %86 : vector<2x384xf32>
    %cst_32 = arith.constant 5.000000e-01 : f32
    %89 = vector.broadcast %cst_32 : f32 to vector<2x384xf32>
    %90 = arith.addf %88, %89 : vector<2x384xf32>
    %91 = vector.extract_strided_slice %90 {offsets = [0, 0], sizes = [2, 128], strides = [1, 1]} : vector<2x384xf32> to vector<2x128xf32>
    %92 = vector.extract_strided_slice %90 {offsets = [0, 128], sizes = [2, 128], strides = [1, 1]} : vector<2x384xf32> to vector<2x128xf32>
    %93 = vector.extract_strided_slice %90 {offsets = [0, 256], sizes = [2, 128], strides = [1, 1]} : vector<2x384xf32> to vector<2x128xf32>
    %94 = vector.extract_strided_slice %82 {offsets = [0, 384], sizes = [2, 128], strides = [1, 1]} : vector<2x512xf32> to vector<2x128xf32>
    %95 = math.tanh %94 : vector<2x128xf32>
    %96 = arith.mulf %92, %64 : vector<2x128xf32>
    %97 = arith.mulf %91, %95 : vector<2x128xf32>
    %98 = arith.addf %96, %97 : vector<2x128xf32>
    %99 = math.tanh %98 : vector<2x128xf32>
    %100 = arith.mulf %93, %99 : vector<2x128xf32>
    %101 = vector.broadcast %3 : vector<1x128xf32> to vector<2x128xf32>
    %102 = arith.mulf %100, %101 : vector<2x128xf32>
    %cst_33 = arith.constant dense<0.000000e+00> : vector<2xf32>
    %103 = vector.multi_reduction <add>, %102, %cst_33 [1] : vector<2x128xf32> to vector<2xf32>
    %104 = vector.shape_cast %103 : vector<2xf32> to vector<2x1xf32>
    %105 = vector.broadcast %c2_i32 : i32 to vector<2x8xi32>
    %106 = arith.cmpi eq, %4, %105 : vector<2x8xi32>
    %107 = vector.shape_cast %104 : vector<2x1xf32> to vector<2x1xf32>
    %108 = vector.broadcast %107 : vector<2x1xf32> to vector<2x8xf32>
    %109 = arith.select %106, %108, %75 : vector<2x8xi1>, vector<2x8xf32>
    %c3_i32 = arith.constant 3 : i32
    %110 = arith.index_cast %c3_i32 : i32 to index
    %c0_34 = arith.constant 0 : index
    %c0_35 = arith.constant 0 : index
    %111 = vector.load %arg1[%110, %c0_34, %c0_35] : memref<8x2x512xf32, #tpu.memory_space<vmem>>, vector<1x2x512xf32>
    %112 = vector.shape_cast %111 : vector<1x2x512xf32> to vector<2x512xf32>
    %113 = arith.truncf %100 : vector<2x128xf32> to vector<2x128xbf16>
    %c0_36 = arith.constant 0 : index
    %c0_37 = arith.constant 0 : index
    %114 = vector.load %arg2[%c0_36, %c0_37] : memref<128x512xbf16, #tpu.memory_space<vmem>>, vector<128x512xbf16>
    %cst_38 = arith.constant dense<0.000000e+00> : vector<2x512xf32>
    %115 = tpu.matmul %113, %114, %cst_38 {dimension_numbers = #tpu.dot_dimension_numbers<[1], [0], [0], [1], [0, 0, 1, 1], [], []>} : vector<2x128xbf16>, vector<128x512xbf16>, vector<2x512xf32> -> vector<2x512xf32>
    %116 = arith.addf %112, %115 : vector<2x512xf32>
    %117 = vector.extract_strided_slice %116 {offsets = [0, 0], sizes = [2, 384], strides = [1, 1]} : vector<2x512xf32> to vector<2x384xf32>
    %cst_39 = arith.constant 5.000000e-01 : f32
    %118 = vector.broadcast %cst_39 : f32 to vector<2x384xf32>
    %119 = arith.mulf %118, %117 : vector<2x384xf32>
    %120 = math.tanh %119 : vector<2x384xf32>
    %cst_40 = arith.constant 5.000000e-01 : f32
    %121 = vector.broadcast %cst_40 : f32 to vector<2x384xf32>
    %122 = arith.mulf %121, %120 : vector<2x384xf32>
    %cst_41 = arith.constant 5.000000e-01 : f32
    %123 = vector.broadcast %cst_41 : f32 to vector<2x384xf32>
    %124 = arith.addf %122, %123 : vector<2x384xf32>
    %125 = vector.extract_strided_slice %124 {offsets = [0, 0], sizes = [2, 128], strides = [1, 1]} : vector<2x384xf32> to vector<2x128xf32>
    %126 = vector.extract_strided_slice %124 {offsets = [0, 128], sizes = [2, 128], strides = [1, 1]} : vector<2x384xf32> to vector<2x128xf32>
    %127 = vector.extract_strided_slice %124 {offsets = [0, 256], sizes = [2, 128], strides = [1, 1]} : vector<2x384xf32> to vector<2x128xf32>
    %128 = vector.extract_strided_slice %116 {offsets = [0, 384], sizes = [2, 128], strides = [1, 1]} : vector<2x512xf32> to vector<2x128xf32>
    %129 = math.tanh %128 : vector<2x128xf32>
    %130 = arith.mulf %126, %98 : vector<2x128xf32>
    %131 = arith.mulf %125, %129 : vector<2x128xf32>
    %132 = arith.addf %130, %131 : vector<2x128xf32>
    %133 = math.tanh %132 : vector<2x128xf32>
    %134 = arith.mulf %127, %133 : vector<2x128xf32>
    %135 = vector.broadcast %3 : vector<1x128xf32> to vector<2x128xf32>
    %136 = arith.mulf %134, %135 : vector<2x128xf32>
    %cst_42 = arith.constant dense<0.000000e+00> : vector<2xf32>
    %137 = vector.multi_reduction <add>, %136, %cst_42 [1] : vector<2x128xf32> to vector<2xf32>
    %138 = vector.shape_cast %137 : vector<2xf32> to vector<2x1xf32>
    %139 = vector.broadcast %c3_i32 : i32 to vector<2x8xi32>
    %140 = arith.cmpi eq, %4, %139 : vector<2x8xi32>
    %141 = vector.shape_cast %138 : vector<2x1xf32> to vector<2x1xf32>
    %142 = vector.broadcast %141 : vector<2x1xf32> to vector<2x8xf32>
    %143 = arith.select %140, %142, %109 : vector<2x8xi1>, vector<2x8xf32>
    %c4_i32 = arith.constant 4 : i32
    %144 = arith.index_cast %c4_i32 : i32 to index
    %c0_43 = arith.constant 0 : index
    %c0_44 = arith.constant 0 : index
    %145 = vector.load %arg1[%144, %c0_43, %c0_44] : memref<8x2x512xf32, #tpu.memory_space<vmem>>, vector<1x2x512xf32>
    %146 = vector.shape_cast %145 : vector<1x2x512xf32> to vector<2x512xf32>
    %147 = arith.truncf %134 : vector<2x128xf32> to vector<2x128xbf16>
    %c0_45 = arith.constant 0 : index
    %c0_46 = arith.constant 0 : index
    %148 = vector.load %arg2[%c0_45, %c0_46] : memref<128x512xbf16, #tpu.memory_space<vmem>>, vector<128x512xbf16>
    %cst_47 = arith.constant dense<0.000000e+00> : vector<2x512xf32>
    %149 = tpu.matmul %147, %148, %cst_47 {dimension_numbers = #tpu.dot_dimension_numbers<[1], [0], [0], [1], [0, 0, 1, 1], [], []>} : vector<2x128xbf16>, vector<128x512xbf16>, vector<2x512xf32> -> vector<2x512xf32>
    %150 = arith.addf %146, %149 : vector<2x512xf32>
    %151 = vector.extract_strided_slice %150 {offsets = [0, 0], sizes = [2, 384], strides = [1, 1]} : vector<2x512xf32> to vector<2x384xf32>
    %cst_48 = arith.constant 5.000000e-01 : f32
    %152 = vector.broadcast %cst_48 : f32 to vector<2x384xf32>
    %153 = arith.mulf %152, %151 : vector<2x384xf32>
    %154 = math.tanh %153 : vector<2x384xf32>
    %cst_49 = arith.constant 5.000000e-01 : f32
    %155 = vector.broadcast %cst_49 : f32 to vector<2x384xf32>
    %156 = arith.mulf %155, %154 : vector<2x384xf32>
    %cst_50 = arith.constant 5.000000e-01 : f32
    %157 = vector.broadcast %cst_50 : f32 to vector<2x384xf32>
    %158 = arith.addf %156, %157 : vector<2x384xf32>
    %159 = vector.extract_strided_slice %158 {offsets = [0, 0], sizes = [2, 128], strides = [1, 1]} : vector<2x384xf32> to vector<2x128xf32>
    %160 = vector.extract_strided_slice %158 {offsets = [0, 128], sizes = [2, 128], strides = [1, 1]} : vector<2x384xf32> to vector<2x128xf32>
    %161 = vector.extract_strided_slice %158 {offsets = [0, 256], sizes = [2, 128], strides = [1, 1]} : vector<2x384xf32> to vector<2x128xf32>
    %162 = vector.extract_strided_slice %150 {offsets = [0, 384], sizes = [2, 128], strides = [1, 1]} : vector<2x512xf32> to vector<2x128xf32>
    %163 = math.tanh %162 : vector<2x128xf32>
    %164 = arith.mulf %160, %132 : vector<2x128xf32>
    %165 = arith.mulf %159, %163 : vector<2x128xf32>
    %166 = arith.addf %164, %165 : vector<2x128xf32>
    %167 = math.tanh %166 : vector<2x128xf32>
    %168 = arith.mulf %161, %167 : vector<2x128xf32>
    %169 = vector.broadcast %3 : vector<1x128xf32> to vector<2x128xf32>
    %170 = arith.mulf %168, %169 : vector<2x128xf32>
    %cst_51 = arith.constant dense<0.000000e+00> : vector<2xf32>
    %171 = vector.multi_reduction <add>, %170, %cst_51 [1] : vector<2x128xf32> to vector<2xf32>
    %172 = vector.shape_cast %171 : vector<2xf32> to vector<2x1xf32>
    %173 = vector.broadcast %c4_i32 : i32 to vector<2x8xi32>
    %174 = arith.cmpi eq, %4, %173 : vector<2x8xi32>
    %175 = vector.shape_cast %172 : vector<2x1xf32> to vector<2x1xf32>
    %176 = vector.broadcast %175 : vector<2x1xf32> to vector<2x8xf32>
    %177 = arith.select %174, %176, %143 : vector<2x8xi1>, vector<2x8xf32>
    %c5_i32 = arith.constant 5 : i32
    %178 = arith.index_cast %c5_i32 : i32 to index
    %c0_52 = arith.constant 0 : index
    %c0_53 = arith.constant 0 : index
    %179 = vector.load %arg1[%178, %c0_52, %c0_53] : memref<8x2x512xf32, #tpu.memory_space<vmem>>, vector<1x2x512xf32>
    %180 = vector.shape_cast %179 : vector<1x2x512xf32> to vector<2x512xf32>
    %181 = arith.truncf %168 : vector<2x128xf32> to vector<2x128xbf16>
    %c0_54 = arith.constant 0 : index
    %c0_55 = arith.constant 0 : index
    %182 = vector.load %arg2[%c0_54, %c0_55] : memref<128x512xbf16, #tpu.memory_space<vmem>>, vector<128x512xbf16>
    %cst_56 = arith.constant dense<0.000000e+00> : vector<2x512xf32>
    %183 = tpu.matmul %181, %182, %cst_56 {dimension_numbers = #tpu.dot_dimension_numbers<[1], [0], [0], [1], [0, 0, 1, 1], [], []>} : vector<2x128xbf16>, vector<128x512xbf16>, vector<2x512xf32> -> vector<2x512xf32>
    %184 = arith.addf %180, %183 : vector<2x512xf32>
    %185 = vector.extract_strided_slice %184 {offsets = [0, 0], sizes = [2, 384], strides = [1, 1]} : vector<2x512xf32> to vector<2x384xf32>
    %cst_57 = arith.constant 5.000000e-01 : f32
    %186 = vector.broadcast %cst_57 : f32 to vector<2x384xf32>
    %187 = arith.mulf %186, %185 : vector<2x384xf32>
    %188 = math.tanh %187 : vector<2x384xf32>
    %cst_58 = arith.constant 5.000000e-01 : f32
    %189 = vector.broadcast %cst_58 : f32 to vector<2x384xf32>
    %190 = arith.mulf %189, %188 : vector<2x384xf32>
    %cst_59 = arith.constant 5.000000e-01 : f32
    %191 = vector.broadcast %cst_59 : f32 to vector<2x384xf32>
    %192 = arith.addf %190, %191 : vector<2x384xf32>
    %193 = vector.extract_strided_slice %192 {offsets = [0, 0], sizes = [2, 128], strides = [1, 1]} : vector<2x384xf32> to vector<2x128xf32>
    %194 = vector.extract_strided_slice %192 {offsets = [0, 128], sizes = [2, 128], strides = [1, 1]} : vector<2x384xf32> to vector<2x128xf32>
    %195 = vector.extract_strided_slice %192 {offsets = [0, 256], sizes = [2, 128], strides = [1, 1]} : vector<2x384xf32> to vector<2x128xf32>
    %196 = vector.extract_strided_slice %184 {offsets = [0, 384], sizes = [2, 128], strides = [1, 1]} : vector<2x512xf32> to vector<2x128xf32>
    %197 = math.tanh %196 : vector<2x128xf32>
    %198 = arith.mulf %194, %166 : vector<2x128xf32>
    %199 = arith.mulf %193, %197 : vector<2x128xf32>
    %200 = arith.addf %198, %199 : vector<2x128xf32>
    %201 = math.tanh %200 : vector<2x128xf32>
    %202 = arith.mulf %195, %201 : vector<2x128xf32>
    %203 = vector.broadcast %3 : vector<1x128xf32> to vector<2x128xf32>
    %204 = arith.mulf %202, %203 : vector<2x128xf32>
    %cst_60 = arith.constant dense<0.000000e+00> : vector<2xf32>
    %205 = vector.multi_reduction <add>, %204, %cst_60 [1] : vector<2x128xf32> to vector<2xf32>
    %206 = vector.shape_cast %205 : vector<2xf32> to vector<2x1xf32>
    %207 = vector.broadcast %c5_i32 : i32 to vector<2x8xi32>
    %208 = arith.cmpi eq, %4, %207 : vector<2x8xi32>
    %209 = vector.shape_cast %206 : vector<2x1xf32> to vector<2x1xf32>
    %210 = vector.broadcast %209 : vector<2x1xf32> to vector<2x8xf32>
    %211 = arith.select %208, %210, %177 : vector<2x8xi1>, vector<2x8xf32>
    %c6_i32 = arith.constant 6 : i32
    %212 = arith.index_cast %c6_i32 : i32 to index
    %c0_61 = arith.constant 0 : index
    %c0_62 = arith.constant 0 : index
    %213 = vector.load %arg1[%212, %c0_61, %c0_62] : memref<8x2x512xf32, #tpu.memory_space<vmem>>, vector<1x2x512xf32>
    %214 = vector.shape_cast %213 : vector<1x2x512xf32> to vector<2x512xf32>
    %215 = arith.truncf %202 : vector<2x128xf32> to vector<2x128xbf16>
    %c0_63 = arith.constant 0 : index
    %c0_64 = arith.constant 0 : index
    %216 = vector.load %arg2[%c0_63, %c0_64] : memref<128x512xbf16, #tpu.memory_space<vmem>>, vector<128x512xbf16>
    %cst_65 = arith.constant dense<0.000000e+00> : vector<2x512xf32>
    %217 = tpu.matmul %215, %216, %cst_65 {dimension_numbers = #tpu.dot_dimension_numbers<[1], [0], [0], [1], [0, 0, 1, 1], [], []>} : vector<2x128xbf16>, vector<128x512xbf16>, vector<2x512xf32> -> vector<2x512xf32>
    %218 = arith.addf %214, %217 : vector<2x512xf32>
    %219 = vector.extract_strided_slice %218 {offsets = [0, 0], sizes = [2, 384], strides = [1, 1]} : vector<2x512xf32> to vector<2x384xf32>
    %cst_66 = arith.constant 5.000000e-01 : f32
    %220 = vector.broadcast %cst_66 : f32 to vector<2x384xf32>
    %221 = arith.mulf %220, %219 : vector<2x384xf32>
    %222 = math.tanh %221 : vector<2x384xf32>
    %cst_67 = arith.constant 5.000000e-01 : f32
    %223 = vector.broadcast %cst_67 : f32 to vector<2x384xf32>
    %224 = arith.mulf %223, %222 : vector<2x384xf32>
    %cst_68 = arith.constant 5.000000e-01 : f32
    %225 = vector.broadcast %cst_68 : f32 to vector<2x384xf32>
    %226 = arith.addf %224, %225 : vector<2x384xf32>
    %227 = vector.extract_strided_slice %226 {offsets = [0, 0], sizes = [2, 128], strides = [1, 1]} : vector<2x384xf32> to vector<2x128xf32>
    %228 = vector.extract_strided_slice %226 {offsets = [0, 128], sizes = [2, 128], strides = [1, 1]} : vector<2x384xf32> to vector<2x128xf32>
    %229 = vector.extract_strided_slice %226 {offsets = [0, 256], sizes = [2, 128], strides = [1, 1]} : vector<2x384xf32> to vector<2x128xf32>
    %230 = vector.extract_strided_slice %218 {offsets = [0, 384], sizes = [2, 128], strides = [1, 1]} : vector<2x512xf32> to vector<2x128xf32>
    %231 = math.tanh %230 : vector<2x128xf32>
    %232 = arith.mulf %228, %200 : vector<2x128xf32>
    %233 = arith.mulf %227, %231 : vector<2x128xf32>
    %234 = arith.addf %232, %233 : vector<2x128xf32>
    %235 = math.tanh %234 : vector<2x128xf32>
    %236 = arith.mulf %229, %235 : vector<2x128xf32>
    %237 = vector.broadcast %3 : vector<1x128xf32> to vector<2x128xf32>
    %238 = arith.mulf %236, %237 : vector<2x128xf32>
    %cst_69 = arith.constant dense<0.000000e+00> : vector<2xf32>
    %239 = vector.multi_reduction <add>, %238, %cst_69 [1] : vector<2x128xf32> to vector<2xf32>
    %240 = vector.shape_cast %239 : vector<2xf32> to vector<2x1xf32>
    %241 = vector.broadcast %c6_i32 : i32 to vector<2x8xi32>
    %242 = arith.cmpi eq, %4, %241 : vector<2x8xi32>
    %243 = vector.shape_cast %240 : vector<2x1xf32> to vector<2x1xf32>
    %244 = vector.broadcast %243 : vector<2x1xf32> to vector<2x8xf32>
    %245 = arith.select %242, %244, %211 : vector<2x8xi1>, vector<2x8xf32>
    %c7_i32 = arith.constant 7 : i32
    %246 = arith.index_cast %c7_i32 : i32 to index
    %c0_70 = arith.constant 0 : index
    %c0_71 = arith.constant 0 : index
    %247 = vector.load %arg1[%246, %c0_70, %c0_71] : memref<8x2x512xf32, #tpu.memory_space<vmem>>, vector<1x2x512xf32>
    %248 = vector.shape_cast %247 : vector<1x2x512xf32> to vector<2x512xf32>
    %249 = arith.truncf %236 : vector<2x128xf32> to vector<2x128xbf16>
    %c0_72 = arith.constant 0 : index
    %c0_73 = arith.constant 0 : index
    %250 = vector.load %arg2[%c0_72, %c0_73] : memref<128x512xbf16, #tpu.memory_space<vmem>>, vector<128x512xbf16>
    %cst_74 = arith.constant dense<0.000000e+00> : vector<2x512xf32>
    %251 = tpu.matmul %249, %250, %cst_74 {dimension_numbers = #tpu.dot_dimension_numbers<[1], [0], [0], [1], [0, 0, 1, 1], [], []>} : vector<2x128xbf16>, vector<128x512xbf16>, vector<2x512xf32> -> vector<2x512xf32>
    %252 = arith.addf %248, %251 : vector<2x512xf32>
    %253 = vector.extract_strided_slice %252 {offsets = [0, 0], sizes = [2, 384], strides = [1, 1]} : vector<2x512xf32> to vector<2x384xf32>
    %cst_75 = arith.constant 5.000000e-01 : f32
    %254 = vector.broadcast %cst_75 : f32 to vector<2x384xf32>
    %255 = arith.mulf %254, %253 : vector<2x384xf32>
    %256 = math.tanh %255 : vector<2x384xf32>
    %cst_76 = arith.constant 5.000000e-01 : f32
    %257 = vector.broadcast %cst_76 : f32 to vector<2x384xf32>
    %258 = arith.mulf %257, %256 : vector<2x384xf32>
    %cst_77 = arith.constant 5.000000e-01 : f32
    %259 = vector.broadcast %cst_77 : f32 to vector<2x384xf32>
    %260 = arith.addf %258, %259 : vector<2x384xf32>
    %261 = vector.extract_strided_slice %260 {offsets = [0, 0], sizes = [2, 128], strides = [1, 1]} : vector<2x384xf32> to vector<2x128xf32>
    %262 = vector.extract_strided_slice %260 {offsets = [0, 128], sizes = [2, 128], strides = [1, 1]} : vector<2x384xf32> to vector<2x128xf32>
    %263 = vector.extract_strided_slice %260 {offsets = [0, 256], sizes = [2, 128], strides = [1, 1]} : vector<2x384xf32> to vector<2x128xf32>
    %264 = vector.extract_strided_slice %252 {offsets = [0, 384], sizes = [2, 128], strides = [1, 1]} : vector<2x512xf32> to vector<2x128xf32>
    %265 = math.tanh %264 : vector<2x128xf32>
    %266 = arith.mulf %262, %234 : vector<2x128xf32>
    %267 = arith.mulf %261, %265 : vector<2x128xf32>
    %268 = arith.addf %266, %267 : vector<2x128xf32>
    %269 = math.tanh %268 : vector<2x128xf32>
    %270 = arith.mulf %263, %269 : vector<2x128xf32>
    %271 = vector.broadcast %3 : vector<1x128xf32> to vector<2x128xf32>
    %272 = arith.mulf %270, %271 : vector<2x128xf32>
    %cst_78 = arith.constant dense<0.000000e+00> : vector<2xf32>
    %273 = vector.multi_reduction <add>, %272, %cst_78 [1] : vector<2x128xf32> to vector<2xf32>
    %274 = vector.shape_cast %273 : vector<2xf32> to vector<2x1xf32>
    %275 = vector.broadcast %c7_i32 : i32 to vector<2x8xi32>
    %276 = arith.cmpi eq, %4, %275 : vector<2x8xi32>
    %277 = vector.shape_cast %274 : vector<2x1xf32> to vector<2x1xf32>
    %278 = vector.broadcast %277 : vector<2x1xf32> to vector<2x8xf32>
    %279 = arith.select %276, %278, %245 : vector<2x8xi1>, vector<2x8xf32>
    %c8_i32 = arith.constant 8 : i32
    %c0_79 = arith.constant 0 : index
    %c0_80 = arith.constant 0 : index
    %c0_81 = arith.constant 0 : index
    %280 = vector.load %arg4[%c0_79, %c0_80, %c0_81] : memref<1x2x8xf32, #tpu.memory_space<vmem>>, vector<1x2x8xf32>
    %281 = vector.shape_cast %280 : vector<1x2x8xf32> to vector<2x8xf32>
    %282 = vector.shape_cast %279 : vector<2x8xf32> to vector<1x2x8xf32>
    tpu.vector_store %arg4[%c0_79, %c0_80, %c0_81], %282 {strides = array<i32>} : memref<1x2x8xf32, #tpu.memory_space<vmem>>, vector<1x2x8xf32>,
    %c0_82 = arith.constant 0 : index
    %c0_83 = arith.constant 0 : index
    %283 = vector.load %arg5[%c0_82, %c0_83] : memref<2x128xf32, #tpu.memory_space<vmem>>, vector<2x128xf32>
    tpu.vector_store %arg5[%c0_82, %c0_83], %270 {strides = array<i32>} : memref<2x128xf32, #tpu.memory_space<vmem>>, vector<2x128xf32>,
    %c0_84 = arith.constant 0 : index
    %c0_85 = arith.constant 0 : index
    %284 = vector.load %arg6[%c0_84, %c0_85] : memref<2x128xf32, #tpu.memory_space<vmem>>, vector<2x128xf32>
    tpu.vector_store %arg6[%c0_84, %c0_85], %268 {strides = array<i32>} : memref<2x128xf32, #tpu.memory_space<vmem>>, vector<2x128xf32>,
    return
  }
  func.func @transform_0(%arg0: i32) -> (i32, i32, i32) {
    %c0_i32 = arith.constant 0 : i32
    %c0_i32_0 = arith.constant 0 : i32
    %c0_i32_1 = arith.constant 0 : i32
    return %arg0, %c0_i32, %c0_i32_0 : i32, i32, i32
  }
  func.func @transform_1(%arg0: i32) -> (i32, i32) {
    %c0_i32 = arith.constant 0 : i32
    %c0_i32_0 = arith.constant 0 : i32
    %c0_i32_1 = arith.constant 0 : i32
    return %c0_i32, %c0_i32_0 : i32, i32
  }
  func.func @transform_2(%arg0: i32) -> (i32, i32) {
    %c0_i32 = arith.constant 0 : i32
    %c0_i32_0 = arith.constant 0 : i32
    %c0_i32_1 = arith.constant 0 : i32
    return %c0_i32, %c0_i32_0 : i32, i32
  }
  func.func @transform_3(%arg0: i32) -> (i32, i32, i32) {
    %c0_i32 = arith.constant 0 : i32
    %c0_i32_0 = arith.constant 0 : i32
    %c0_i32_1 = arith.constant 0 : i32
    return %arg0, %c0_i32, %c0_i32_0 : i32, i32, i32
  }
}

</mosaic_0001>

<bundles_post_ra>
// kernel: _lambda_.1
= control target key start
LH: loop header
LB: loop body
LE: loop exit
PB: predicated region body
PF: predicated region fallthrough
CT: control target
= control target key end

     0   :  { %v1440_v1 = vmov 0   ;;  %v1441_v2 = vmov 0.0   ;;  %v22_v36 = vlaneseq  ;;  %v1442_v37 = vmov 1983009808   ;;  %s2013_s1 = inlined_call_operand.vmem [shape: bf16[128,512], index: 1, kind: input, shape index: {}]   ;;  %s2014_s0 = inlined_call_operand.vmem [shape: f32[8,2,512], index: 0, kind: input, shape index: {}]   ;;  %s2015_s2 = inlined_call_operand.vmem [shape: f32[1,128], index: 2, kind: input, shape index: {}]   ;;  %s2016_s3 = inlined_call_operand.vmem [shape: f32[1,2,8], index: 3, kind: output, shape index: {}]  }
   0x1   :  { %v1466_v0 = vld [vmem:[%s2013_s1 + $0x4] ss:$16 sps:$4 sm:$0xff]   ;;  %252 = vmatprep.mubr.bf16.mxu0 %v1440_v1  ;;  %293 = vmatprep.mubr.bf16.mxu1 %v1440_v1  ;;  %19 = vst [vmem:[#allocation2] sm:$0x3] %v1441_v2  ;;  %20 = vst [vmem:[#allocation3] sm:$0x3] %v1441_v2  ;;  %v309_v38 = vunpack.c.l.s4 %v1442_v37 }
   0x2   :  { %v1473_v3 = vld [vmem:[%s2013_s1 + $0xc] ss:$16 sps:$4 sm:$0xff]   ;;  %220 = vmatprep.subr.bf16.mxu0 %v1466_v0  ;;  %v1479_v4 = vld [vmem:[%s2013_s1] ss:$16 sps:$4 sm:$0xff]   ;;  %v1484_v5 = vld [vmem:[%s2013_s1 + $0x8] ss:$16 sps:$4 sm:$0xff]  }
   0x3   :  { %261 = vmatprep.subr.bf16.mxu1 %v1473_v3  ;;  %v1490_v6 = vld [vmem:[%s2013_s1 + $0x24] ss:$16 sps:$4 sm:$0xff]   ;;  %221 = vmatpush1.bf16.msra.mxu0 %v1479_v4  ;;  %v1497_v7 = vld [vmem:[%s2013_s1 + $0x2c] ss:$16 sps:$4 sm:$0xff]   ;;  %v1502_v8 = vld [vmem:[%s2013_s1 + $0x20] ss:$16 sps:$4 sm:$0xff]   ;;  %v310_v39 = vunpack.c.0.s8 %v309_v38 }
   0x4   :  { %262 = vmatpush1.bf16.msra.mxu1 %v1484_v5  ;;  %222 = vmatprep.subr.bf16.mxu0 %v1490_v6  ;;  %v1508_v9 = vld [vmem:[%s2013_s1 + $0x28] ss:$16 sps:$4 sm:$0xff]   ;;  %v1514_v10 = vld [vmem:[%s2013_s1 + $0x44] ss:$16 sps:$4 sm:$0xff]   ;;  %v1519_v11 = vld [vmem:[%s2013_s1 + $0x4c] ss:$16 sps:$4 sm:$0xff]  }
   0x5   :  { %263 = vmatprep.subr.bf16.mxu1 %v1497_v7  ;;  %v1524_v12 = vld [vmem:[%s2013_s1 + $0x40] ss:$16 sps:$4 sm:$0xff]   ;;  %v1529_v13 = vld [vmem:[%s2013_s1 + $0x48] ss:$16 sps:$4 sm:$0xff]   ;;  %v1536_v14 = vld [vmem:[%s2013_s1 + $0x64] ss:$16 sps:$4 sm:$0xff]  }
   0x6   :  { %v1543_v15 = vld [vmem:[%s2013_s1 + $0x6c] ss:$16 sps:$4 sm:$0xff]   ;;  %v1548_v16 = vld [vmem:[%s2013_s1 + $0x60] ss:$16 sps:$4 sm:$0xff]   ;;  %v1555_v17 = vld [vmem:[%s2013_s1 + $0x68] ss:$16 sps:$4 sm:$0xff]  }
   0x7   :  { %223 = vmatpush1.bf16.msra.mxu0 %v1502_v8  ;;  %v1560_v18 = vld [vmem:[%s2013_s1 + $0x84] ss:$16 sps:$4 sm:$0xff]   ;;  %v1567_v19 = vld [vmem:[%s2013_s1 + $0x8c] ss:$16 sps:$4 sm:$0xff]   ;;  %v1572_v20 = vld [vmem:[%s2013_s1 + $0x80] ss:$16 sps:$4 sm:$0xff]  }
   0x8   :  { %264 = vmatpush1.bf16.msra.mxu1 %v1508_v9  ;;  %224 = vmatprep.subr.bf16.mxu0 %v1514_v10  ;;  %v1577_v21 = vld [vmem:[%s2013_s1 + $0x88] ss:$16 sps:$4 sm:$0xff]   ;;  %v1584_v22 = vld [vmem:[%s2013_s1 + $0xa4] ss:$16 sps:$4 sm:$0xff]   ;;  %v1591_v23 = vld [vmem:[%s2013_s1 + $0xac] ss:$16 sps:$4 sm:$0xff]  }
   0x9   :  { %265 = vmatprep.subr.bf16.mxu1 %v1519_v11  ;;  %v1598_v24 = vld [vmem:[%s2013_s1 + $0xa0] ss:$16 sps:$4 sm:$0xff]   ;;  %v1603_v25 = vld [vmem:[%s2013_s1 + $0xa8] ss:$16 sps:$4 sm:$0xff]   ;;  %v1610_v26 = vld [vmem:[%s2013_s1 + $0xc4] ss:$16 sps:$4 sm:$0xff]  }
   0xa   :  { %v1615_v27 = vld [vmem:[%s2013_s1 + $0xcc] ss:$16 sps:$4 sm:$0xff]   ;;  %v1622_v28 = vld [vmem:[%s2013_s1 + $0xc0] ss:$16 sps:$4 sm:$0xff]   ;;  %v1627_v29 = vld [vmem:[%s2013_s1 + $0xc8] ss:$16 sps:$4 sm:$0xff]  }
   0xb   :  { %225 = vmatpush1.bf16.msra.mxu0 %v1524_v12  ;;  %v1634_v30 = vld [vmem:[%s2013_s1 + $0xe4] ss:$16 sps:$4 sm:$0xff]   ;;  %v1639_v31 = vld [vmem:[%s2013_s1 + $0xec] ss:$16 sps:$4 sm:$0xff]   ;;  %v1646_v32 = vld [vmem:[%s2013_s1 + $0xe0] ss:$16 sps:$4 sm:$0xff]  }
   0xc   :  { %266 = vmatpush1.bf16.msra.mxu1 %v1529_v13  ;;  %226 = vmatprep.subr.bf16.mxu0 %v1536_v14  ;;  %v1651_v33 = vld [vmem:[%s2013_s1 + $0xe8] ss:$16 sps:$4 sm:$0xff]   ;;  %v24_v34 = vld [vmem:[#allocation2] sm:$0x3]  ;;  %v312_v40 = vshrl.u32 %v22_v36, 7  ;;  %vm350_vm0 = vcmask 1041408  }
   0xd   :  { %267 = vmatprep.subr.bf16.mxu1 %v1543_v15  ;;  %v27_v35 = vpack.c.bf16 %v24_v34, %v24_v34  ;;  %v26_v54 = vld [vmem:[%s2014_s0] sm:$0xff]  ;;  %vm1280_vm9 = vcmask 58368  }
   0xe   :  { %v1694_v43 = vsub.s32 %v310_v39, %v312_v40  ;;  %v25_v62 = vld [vmem:[#allocation3] sm:$0x3]  ;;  %v1707_v40 = vld [vmem:[%s2015_s2] ss:$0 sm:$0xff] }
   0xf   :  { %227 = vmatpush1.bf16.msra.mxu0 %v1548_v16 }
  0x10   :  { %268 = vmatpush1.bf16.msra.mxu1 %v1555_v17  ;;  %228 = vmatprep.subr.bf16.mxu0 %v1560_v18 }
  0x11   :  { %269 = vmatprep.subr.bf16.mxu1 %v1567_v19 }
  0x13   :  { %229 = vmatpush1.bf16.msra.mxu0 %v1572_v20 }
  0x14   :  { %270 = vmatpush1.bf16.msra.mxu1 %v1577_v21  ;;  %230 = vmatprep.subr.bf16.mxu0 %v1584_v22 }
  0x15   :  { %271 = vmatprep.subr.bf16.mxu1 %v1591_v23 }
  0x17   :  { %231 = vmatpush1.bf16.msra.mxu0 %v1598_v24 }
  0x18   :  { %272 = vmatpush1.bf16.msra.mxu1 %v1603_v25  ;;  %232 = vmatprep.subr.bf16.mxu0 %v1610_v26 }
  0x19   :  { %273 = vmatprep.subr.bf16.mxu1 %v1615_v27 }
  0x1b   :  { %233 = vmatpush1.bf16.msra.mxu0 %v1622_v28 }
  0x1c   :  { %274 = vmatpush1.bf16.msra.mxu1 %v1627_v29  ;;  %234 = vmatprep.subr.bf16.mxu0 %v1634_v30 }
  0x1d   :  { %275 = vmatprep.subr.bf16.mxu1 %v1639_v31 }
  0x1f   :  { %235 = vmatpush1.bf16.msra.mxu0 %v1646_v32 }
  0x20   :  { %276 = vmatpush1.bf16.msra.mxu1 %v1651_v33  ;;  %359 = vmatprep.subr.bf16.mxu0 %v1466_v0 }
  0x21   :  { %400 = vmatprep.subr.bf16.mxu1 %v1473_v3 }
  0x22   :  { %253 = vmatmul.mubr.bf16.vlgmr.msra.gmra.mrb[0].mxu0 %v27_v35 }
  0x23   :  { %294 = vmatmul.mubr.bf16.vlgmr.msra.gmra.mrb[0].mxu1 %v27_v35  ;;  %360 = vmatpush1.bf16.msra.mxu0 %v1479_v4 }
  0x24   :  { %401 = vmatpush1.bf16.msra.mxu1 %v1484_v5  ;;  %361 = vmatprep.subr.bf16.mxu0 %v1490_v6 }
  0x25   :  { %402 = vmatprep.subr.bf16.mxu1 %v1497_v7  ;;  %391 = vmatprep.mubr.bf16.mxu0 %v1440_v1 }
  0x26   :  { %432 = vmatprep.mubr.bf16.mxu1 %v1440_v1 }
  0x27   :  { %362 = vmatpush1.bf16.msra.mxu0 %v1502_v8 }
  0x28   :  { %403 = vmatpush1.bf16.msra.mxu1 %v1508_v9  ;;  %363 = vmatprep.subr.bf16.mxu0 %v1514_v10 }
  0x29   :  { %404 = vmatprep.subr.bf16.mxu1 %v1519_v11 }
  0x2b   :  { %364 = vmatpush1.bf16.msra.mxu0 %v1524_v12 }
  0x2c   :  { %405 = vmatpush1.bf16.msra.mxu1 %v1529_v13  ;;  %365 = vmatprep.subr.bf16.mxu0 %v1536_v14 }
  0x2d   :  { %406 = vmatprep.subr.bf16.mxu1 %v1543_v15 }
  0x2f   :  { %366 = vmatpush1.bf16.msra.mxu0 %v1548_v16 }
  0x30   :  { %407 = vmatpush1.bf16.msra.mxu1 %v1555_v17  ;;  %367 = vmatprep.subr.bf16.mxu0 %v1560_v18 }
  0x31   :  { %408 = vmatprep.subr.bf16.mxu1 %v1567_v19 }
  0x33   :  { %368 = vmatpush1.bf16.msra.mxu0 %v1572_v20 }
  0x34   :  { %409 = vmatpush1.bf16.msra.mxu1 %v1577_v21  ;;  %369 = vmatprep.subr.bf16.mxu0 %v1584_v22 }
  0x35   :  { %410 = vmatprep.subr.bf16.mxu1 %v1591_v23 }
  0x37   :  { %370 = vmatpush1.bf16.msra.mxu0 %v1598_v24 }
  0x38   :  { %411 = vmatpush1.bf16.msra.mxu1 %v1603_v25  ;;  %371 = vmatprep.subr.bf16.mxu0 %v1610_v26 }
  0x39   :  { %412 = vmatprep.subr.bf16.mxu1 %v1615_v27 }
  0x3b   :  { %372 = vmatpush1.bf16.msra.mxu0 %v1622_v28 }
  0x3c   :  { %413 = vmatpush1.bf16.msra.mxu1 %v1627_v29  ;;  %373 = vmatprep.subr.bf16.mxu0 %v1634_v30 }
  0x3d   :  { %414 = vmatprep.subr.bf16.mxu1 %v1639_v31 }
  0x3f   :  { %374 = vmatpush1.bf16.msra.mxu0 %v1646_v32 }
  0x40   :  { %415 = vmatpush1.bf16.msra.mxu1 %v1651_v33  ;;  %491 = vmatprep.subr.bf16.mxu0 %v1466_v0 }
  0x41   :  { %532 = vmatprep.subr.bf16.mxu1 %v1473_v3 }
  0xf5   :  { %v254_v41 = vpop.f32.mrb[0].mxu0 }
  0xf6   :  { %v295_v42 = vpop.f32.mrb[0].mxu1  ;;  %v256_v44 = vpop.f32.mrb[1].mxu0 }
  0xf7   :  { %v297_v45 = vpop.f32.mrb[1].mxu1  ;;  %v306_v46 = vcombine.low %v254_v41, %v256_v44  ;;  %v258_v48 = vpop.f32.mrb[2].mxu0 }
  0xf8   :  { %v307_v47 = vcombine.low %v295_v42, %v297_v45  ;;  %v299_v49 = vpop.f32.mrb[2].mxu1  ;;  %v259_v50 = vpop.f32.mrb[3].mxu0 }
  0xf9   :  { %v300_v51 = vpop.f32.mrb[3].mxu1  ;;  %v314_v52 = vrot.slane %v306_v46, %v1694_v43 }
  0xfa   :  { %v321_v53 = vrot.slane %v307_v47, %v1694_v43 }
  0xfc   :  { %v322_v55 = vcombine.low %v314_v52, %v321_v53 }
  0xfe   :  { %v324_v56 = vadd.f32 %v322_v55, %v26_v54 }
 0x100   :  { %v325_v57 = vmul.f32 0.5, %v324_v56  ;;  %v330_v58 = vrot.slane %v324_v56, 6 }
 0x102   :  { %1379 = vtanh.f32 %v325_v57 }
 0x103   :  { %1381 = vtanh.f32 %v330_v58  ;;  %v1321_v58 = vld [vmem:[%s2014_s0 + $0x8] sm:$0xff] }
 0x10c   :  { %v1380_v59 = vpop.eup %1379 }
 0x10d   :  { %v327_v60 = vmul.f32 0.5, %v1380_v59  ;;  %v1382_v2 = vpop.eup %1381 }
 0x10f   :  { %v328_v61 = vadd.f32 0.5, %v327_v60 }
 0x111   :  { %v334_v63 = vrot.slane %v328_v61, 2  ;;  %v337_v35 = vmul.f32 %v1382_v2, %v328_v61  ;;  %v340_v38 = vrot.slane %v328_v61, 4 }
 0x113   :  { %v336_v34 = vmul.f32 %v334_v63, %v25_v62 }
 0x115   :  { %v1701_v37 = vadd.f32 %v337_v35, %v336_v34 }
 0x117   :  { %1383 = vtanh.f32 %v1701_v37 }
 0x121   :  { %v1384_v39 = vpop.eup %1383 }
 0x122   :  { %v342_v41 = vmul.f32 %v1384_v39, %v340_v38 }
 0x124   :  { %v358_v42 = vpack.c.bf16 %v342_v41, %v342_v41  ;;  %v349_v44 = vmul.f32 %v1707_v40, %v342_v41 }
 0x126   :  { %392 = vmatmul.mubr.bf16.vlgmr.msra.gmra.mrb[4].mxu0 %v358_v42  ;;  %433 = vmatmul.mubr.bf16.vlgmr.msra.gmra.mrb[4].mxu1 %v358_v42  ;;  %v351_v45 = vsel %vm350_vm0, %v349_v44, 0.0 }
 0x127   :  { %352 = vadd.xlane.f32.xlu0 %v351_v45  ;;  %492 = vmatpush1.bf16.msra.mxu0 %v1479_v4 }
 0x128   :  { %533 = vmatpush1.bf16.msra.mxu1 %v1484_v5  ;;  %493 = vmatprep.subr.bf16.mxu0 %v1490_v6 }
 0x129   :  { %534 = vmatprep.subr.bf16.mxu1 %v1497_v7  ;;  %523 = vmatprep.mubr.bf16.mxu0 %v1440_v1 }
 0x12a   :  { %564 = vmatprep.mubr.bf16.mxu1 %v1440_v1 }
 0x12b   :  { %494 = vmatpush1.bf16.msra.mxu0 %v1502_v8 }
 0x12c   :  { %535 = vmatpush1.bf16.msra.mxu1 %v1508_v9  ;;  %495 = vmatprep.subr.bf16.mxu0 %v1514_v10 }
 0x12d   :  { %536 = vmatprep.subr.bf16.mxu1 %v1519_v11 }
 0x12f   :  { %496 = vmatpush1.bf16.msra.mxu0 %v1524_v12 }
 0x130   :  { %537 = vmatpush1.bf16.msra.mxu1 %v1529_v13  ;;  %497 = vmatprep.subr.bf16.mxu0 %v1536_v14 }
 0x131   :  { %538 = vmatprep.subr.bf16.mxu1 %v1543_v15 }
 0x133   :  { %498 = vmatpush1.bf16.msra.mxu0 %v1548_v16 }
 0x134   :  { %539 = vmatpush1.bf16.msra.mxu1 %v1555_v17  ;;  %499 = vmatprep.subr.bf16.mxu0 %v1560_v18 }
 0x135   :  { %540 = vmatprep.subr.bf16.mxu1 %v1567_v19 }
 0x137   :  { %500 = vmatpush1.bf16.msra.mxu0 %v1572_v20 }
 0x138   :  { %541 = vmatpush1.bf16.msra.mxu1 %v1577_v21  ;;  %501 = vmatprep.subr.bf16.mxu0 %v1584_v22 }
 0x139   :  { %542 = vmatprep.subr.bf16.mxu1 %v1591_v23 }
 0x13b   :  { %502 = vmatpush1.bf16.msra.mxu0 %v1598_v24 }
 0x13c   :  { %543 = vmatpush1.bf16.msra.mxu1 %v1603_v25  ;;  %503 = vmatprep.subr.bf16.mxu0 %v1610_v26 }
 0x13d   :  { %544 = vmatprep.subr.bf16.mxu1 %v1615_v27 }
 0x13f   :  { %504 = vmatpush1.bf16.msra.mxu0 %v1622_v28 }
 0x140   :  { %545 = vmatpush1.bf16.msra.mxu1 %v1627_v29  ;;  %505 = vmatprep.subr.bf16.mxu0 %v1634_v30 }
 0x141   :  { %546 = vmatprep.subr.bf16.mxu1 %v1639_v31 }
 0x143   :  { %506 = vmatpush1.bf16.msra.mxu0 %v1646_v32 }
 0x144   :  { %547 = vmatpush1.bf16.msra.mxu1 %v1651_v33  ;;  %623 = vmatprep.subr.bf16.mxu0 %v1466_v0 }
 0x145   :  { %664 = vmatprep.subr.bf16.mxu1 %v1473_v3 }
 0x1f9   :  { %v393_v46 = vpop.f32.mrb[4].mxu0  ;;  %v434_v47 = vpop.f32.mrb[4].mxu1 }
 0x1fa   :  { %v395_v48 = vpop.f32.mrb[5].mxu0  ;;  %v436_v49 = vpop.f32.mrb[5].mxu1 }
 0x1fb   :  { %v445_v50 = vcombine.low %v393_v46, %v395_v48  ;;  %v446_v51 = vcombine.low %v434_v47, %v436_v49  ;;  %v397_v52 = vpop.f32.mrb[6].mxu0  ;;  %v438_v53 = vpop.f32.mrb[6].mxu1 }
 0x1fc   :  { %v398_v54 = vpop.f32.mrb[7].mxu0  ;;  %v439_v55 = vpop.f32.mrb[7].mxu1 }
 0x1fd   :  { %v453_v56 = vrot.slane %v445_v50, %v1694_v43  ;;  %v460_v57 = vrot.slane %v446_v51, %v1694_v43 }
 0x1ff   :  { %v461_v59 = vcombine.low %v453_v56, %v460_v57 }
 0x201   :  { %v463_v60 = vadd.f32 %v1321_v58, %v461_v59 }
 0x203   :  { %v464_v61 = vmul.f32 0.5, %v463_v60  ;;  %v469_v62 = vrot.slane %v463_v60, 6 }
 0x205   :  { %1385 = vtanh.f32 %v464_v61  ;;  %v1322_v61 = vld [vmem:[%s2014_s0 + $0x10] sm:$0xff] }
 0x206   :  { %1387 = vtanh.f32 %v469_v62 }
 0x20f   :  { %v1386_v63 = vpop.eup %1385 }
 0x210   :  { %v466_v2 = vmul.f32 0.5, %v1386_v63  ;;  %v1388_v38 = vpop.eup %1387 }
 0x212   :  { %v467_v34 = vadd.f32 0.5, %v466_v2 }
 0x214   :  { %v473_v35 = vrot.slane %v467_v34, 2  ;;  %v476_v41 = vmul.f32 %v1388_v38, %v467_v34  ;;  %v479_v44 = vrot.slane %v467_v34, 4 }
 0x216   :  { %v475_v39 = vmul.f32 %v473_v35, %v1701_v37 }
 0x218   :  { %v1751_v42 = vadd.f32 %v476_v41, %v475_v39 }
 0x21a   :  { %1389 = vtanh.f32 %v1751_v42 }
 0x224   :  { %v1390_v45 = vpop.eup %1389 }
 0x225   :  { %v481_v46 = vmul.f32 %v1390_v45, %v479_v44 }
 0x227   :  { %v490_v47 = vpack.c.bf16 %v481_v46, %v481_v46  ;;  %v482_v48 = vmul.f32 %v1707_v40, %v481_v46 }
 0x229   :  { %524 = vmatmul.mubr.bf16.vlgmr.msra.gmra.mrb[8].mxu0 %v490_v47  ;;  %565 = vmatmul.mubr.bf16.vlgmr.msra.gmra.mrb[8].mxu1 %v490_v47  ;;  %v483_v49 = vsel %vm350_vm0, %v482_v48, 0.0 }
 0x22a   :  { %484 = vadd.xlane.f32.xlu0 %v483_v49  ;;  %624 = vmatpush1.bf16.msra.mxu0 %v1479_v4 }
 0x22b   :  { %665 = vmatpush1.bf16.msra.mxu1 %v1484_v5  ;;  %625 = vmatprep.subr.bf16.mxu0 %v1490_v6 }
 0x22c   :  { %666 = vmatprep.subr.bf16.mxu1 %v1497_v7  ;;  %655 = vmatprep.mubr.bf16.mxu0 %v1440_v1 }
 0x22d   :  { %696 = vmatprep.mubr.bf16.mxu1 %v1440_v1 }
 0x22e   :  { %626 = vmatpush1.bf16.msra.mxu0 %v1502_v8 }
 0x22f   :  { %667 = vmatpush1.bf16.msra.mxu1 %v1508_v9  ;;  %627 = vmatprep.subr.bf16.mxu0 %v1514_v10 }
 0x230   :  { %668 = vmatprep.subr.bf16.mxu1 %v1519_v11 }
 0x232   :  { %628 = vmatpush1.bf16.msra.mxu0 %v1524_v12 }
 0x233   :  { %669 = vmatpush1.bf16.msra.mxu1 %v1529_v13  ;;  %629 = vmatprep.subr.bf16.mxu0 %v1536_v14 }
 0x234   :  { %670 = vmatprep.subr.bf16.mxu1 %v1543_v15 }
 0x236   :  { %630 = vmatpush1.bf16.msra.mxu0 %v1548_v16 }
 0x237   :  { %671 = vmatpush1.bf16.msra.mxu1 %v1555_v17  ;;  %631 = vmatprep.subr.bf16.mxu0 %v1560_v18 }
 0x238   :  { %672 = vmatprep.subr.bf16.mxu1 %v1567_v19 }
 0x23a   :  { %632 = vmatpush1.bf16.msra.mxu0 %v1572_v20 }
 0x23b   :  { %673 = vmatpush1.bf16.msra.mxu1 %v1577_v21  ;;  %633 = vmatprep.subr.bf16.mxu0 %v1584_v22 }
 0x23c   :  { %674 = vmatprep.subr.bf16.mxu1 %v1591_v23 }
 0x23e   :  { %634 = vmatpush1.bf16.msra.mxu0 %v1598_v24 }
 0x23f   :  { %675 = vmatpush1.bf16.msra.mxu1 %v1603_v25  ;;  %635 = vmatprep.subr.bf16.mxu0 %v1610_v26 }
 0x240   :  { %676 = vmatprep.subr.bf16.mxu1 %v1615_v27 }
 0x242   :  { %636 = vmatpush1.bf16.msra.mxu0 %v1622_v28 }
 0x243   :  { %677 = vmatpush1.bf16.msra.mxu1 %v1627_v29  ;;  %637 = vmatprep.subr.bf16.mxu0 %v1634_v30 }
 0x244   :  { %678 = vmatprep.subr.bf16.mxu1 %v1639_v31 }
 0x246   :  { %638 = vmatpush1.bf16.msra.mxu0 %v1646_v32 }
 0x247   :  { %679 = vmatpush1.bf16.msra.mxu1 %v1651_v33  ;;  %755 = vmatprep.subr.bf16.mxu0 %v1466_v0 }
 0x248   :  { %796 = vmatprep.subr.bf16.mxu1 %v1473_v3 }
 0x2fc   :  { %v525_v37 = vpop.f32.mrb[8].mxu0  ;;  %v566_v50 = vpop.f32.mrb[8].mxu1 }
 0x2fd   :  { %v527_v51 = vpop.f32.mrb[9].mxu0  ;;  %v568_v52 = vpop.f32.mrb[9].mxu1 }
 0x2fe   :  { %v577_v53 = vcombine.low %v525_v37, %v527_v51  ;;  %v578_v54 = vcombine.low %v566_v50, %v568_v52  ;;  %v529_v55 = vpop.f32.mrb[10].mxu0  ;;  %v570_v56 = vpop.f32.mrb[10].mxu1 }
 0x2ff   :  { %v530_v57 = vpop.f32.mrb[11].mxu0  ;;  %v571_v58 = vpop.f32.mrb[11].mxu1 }
 0x300   :  { %v585_v59 = vrot.slane %v577_v53, %v1694_v43  ;;  %v592_v60 = vrot.slane %v578_v54, %v1694_v43 }
 0x302   :  { %v593_v62 = vcombine.low %v585_v59, %v592_v60 }
 0x304   :  { %v595_v63 = vadd.f32 %v1322_v61, %v593_v62 }
 0x306   :  { %v596_v2 = vmul.f32 0.5, %v595_v63  ;;  %v601_v34 = vrot.slane %v595_v63, 6 }
 0x308   :  { %1391 = vtanh.f32 %v596_v2  ;;  %v1323_v2 = vld [vmem:[%s2014_s0 + $0x18] sm:$0xff] }
 0x309   :  { %1393 = vtanh.f32 %v601_v34 }
 0x312   :  { %v1392_v35 = vpop.eup %1391 }
 0x313   :  { %v598_v38 = vmul.f32 0.5, %v1392_v35  ;;  %v1394_v44 = vpop.eup %1393 }
 0x315   :  { %v599_v39 = vadd.f32 0.5, %v598_v38 }
 0x317   :  { %v605_v41 = vrot.slane %v599_v39, 2  ;;  %v608_v46 = vmul.f32 %v1394_v44, %v599_v39  ;;  %v611_v48 = vrot.slane %v599_v39, 4 }
 0x319   :  { %v607_v45 = vmul.f32 %v605_v41, %v1751_v42 }
 0x31b   :  { %v1796_v47 = vadd.f32 %v608_v46, %v607_v45 }
 0x31d   :  { %1395 = vtanh.f32 %v1796_v47 }
 0x327   :  { %v1396_v49 = vpop.eup %1395 }
 0x328   :  { %v613_v37 = vmul.f32 %v1396_v49, %v611_v48 }
 0x32a   :  { %v622_v50 = vpack.c.bf16 %v613_v37, %v613_v37  ;;  %v614_v51 = vmul.f32 %v1707_v40, %v613_v37 }
 0x32c   :  { %656 = vmatmul.mubr.bf16.vlgmr.msra.gmra.mrb[12].mxu0 %v622_v50  ;;  %697 = vmatmul.mubr.bf16.vlgmr.msra.gmra.mrb[12].mxu1 %v622_v50  ;;  %v615_v52 = vsel %vm350_vm0, %v614_v51, 0.0 }
 0x32d   :  { %616 = vadd.xlane.f32.xlu1 %v615_v52  ;;  %756 = vmatpush1.bf16.msra.mxu0 %v1479_v4 }
 0x32e   :  { %797 = vmatpush1.bf16.msra.mxu1 %v1484_v5  ;;  %757 = vmatprep.subr.bf16.mxu0 %v1490_v6 }
 0x32f   :  { %798 = vmatprep.subr.bf16.mxu1 %v1497_v7  ;;  %787 = vmatprep.mubr.bf16.mxu0 %v1440_v1 }
 0x330   :  { %828 = vmatprep.mubr.bf16.mxu1 %v1440_v1 }
 0x331   :  { %758 = vmatpush1.bf16.msra.mxu0 %v1502_v8 }
 0x332   :  { %799 = vmatpush1.bf16.msra.mxu1 %v1508_v9  ;;  %759 = vmatprep.subr.bf16.mxu0 %v1514_v10 }
 0x333   :  { %800 = vmatprep.subr.bf16.mxu1 %v1519_v11 }
 0x335   :  { %760 = vmatpush1.bf16.msra.mxu0 %v1524_v12 }
 0x336   :  { %801 = vmatpush1.bf16.msra.mxu1 %v1529_v13  ;;  %761 = vmatprep.subr.bf16.mxu0 %v1536_v14 }
 0x337   :  { %802 = vmatprep.subr.bf16.mxu1 %v1543_v15 }
 0x339   :  { %762 = vmatpush1.bf16.msra.mxu0 %v1548_v16 }
 0x33a   :  { %803 = vmatpush1.bf16.msra.mxu1 %v1555_v17  ;;  %763 = vmatprep.subr.bf16.mxu0 %v1560_v18 }
 0x33b   :  { %804 = vmatprep.subr.bf16.mxu1 %v1567_v19 }
 0x33d   :  { %764 = vmatpush1.bf16.msra.mxu0 %v1572_v20 }
 0x33e   :  { %805 = vmatpush1.bf16.msra.mxu1 %v1577_v21  ;;  %765 = vmatprep.subr.bf16.mxu0 %v1584_v22 }
 0x33f   :  { %806 = vmatprep.subr.bf16.mxu1 %v1591_v23 }
 0x341   :  { %766 = vmatpush1.bf16.msra.mxu0 %v1598_v24 }
 0x342   :  { %807 = vmatpush1.bf16.msra.mxu1 %v1603_v25  ;;  %767 = vmatprep.subr.bf16.mxu0 %v1610_v26 }
 0x343   :  { %808 = vmatprep.subr.bf16.mxu1 %v1615_v27 }
 0x345   :  { %768 = vmatpush1.bf16.msra.mxu0 %v1622_v28 }
 0x346   :  { %809 = vmatpush1.bf16.msra.mxu1 %v1627_v29  ;;  %769 = vmatprep.subr.bf16.mxu0 %v1634_v30 }
 0x347   :  { %810 = vmatprep.subr.bf16.mxu1 %v1639_v31 }
 0x349   :  { %770 = vmatpush1.bf16.msra.mxu0 %v1646_v32 }
 0x34a   :  { %811 = vmatpush1.bf16.msra.mxu1 %v1651_v33  ;;  %887 = vmatprep.subr.bf16.mxu0 %v1466_v0 }
 0x34b   :  { %928 = vmatprep.subr.bf16.mxu1 %v1473_v3 }
 0x3ff   :  { %v657_v42 = vpop.f32.mrb[12].mxu0  ;;  %v698_v53 = vpop.f32.mrb[12].mxu1 }
 0x400   :  { %v659_v54 = vpop.f32.mrb[13].mxu0  ;;  %v700_v55 = vpop.f32.mrb[13].mxu1 }
 0x401   :  { %v709_v56 = vcombine.low %v657_v42, %v659_v54  ;;  %v710_v57 = vcombine.low %v698_v53, %v700_v55  ;;  %v661_v58 = vpop.f32.mrb[14].mxu0  ;;  %v702_v59 = vpop.f32.mrb[14].mxu1 }
 0x402   :  { %v662_v60 = vpop.f32.mrb[15].mxu0  ;;  %v703_v61 = vpop.f32.mrb[15].mxu1 }
 0x403   :  { %v717_v62 = vrot.slane %v709_v56, %v1694_v43  ;;  %v724_v63 = vrot.slane %v710_v57, %v1694_v43 }
 0x405   :  { %v725_v34 = vcombine.low %v717_v62, %v724_v63 }
 0x407   :  { %v727_v35 = vadd.f32 %v1323_v2, %v725_v34 }
 0x409   :  { %v728_v38 = vmul.f32 0.5, %v727_v35  ;;  %v733_v39 = vrot.slane %v727_v35, 6 }
 0x40b   :  { %1397 = vtanh.f32 %v728_v38  ;;  %v1324_v38 = vld [vmem:[%s2014_s0 + $0x20] sm:$0xff] }
 0x40c   :  { %1399 = vtanh.f32 %v733_v39 }
 0x415   :  { %v1398_v41 = vpop.eup %1397 }
 0x416   :  { %v730_v44 = vmul.f32 0.5, %v1398_v41  ;;  %v1400_v48 = vpop.eup %1399 }
 0x418   :  { %v731_v45 = vadd.f32 0.5, %v730_v44 }
 0x41a   :  { %v737_v46 = vrot.slane %v731_v45, 2  ;;  %v740_v37 = vmul.f32 %v1400_v48, %v731_v45  ;;  %v743_v51 = vrot.slane %v731_v45, 4 }
 0x41c   :  { %v739_v49 = vmul.f32 %v737_v46, %v1796_v47 }
 0x41e   :  { %v1841_v50 = vadd.f32 %v740_v37, %v739_v49 }
 0x420   :  { %1401 = vtanh.f32 %v1841_v50 }
 0x42a   :  { %v1402_v52 = vpop.eup %1401 }
 0x42b   :  { %v745_v42 = vmul.f32 %v1402_v52, %v743_v51 }
 0x42d   :  { %v754_v53 = vpack.c.bf16 %v745_v42, %v745_v42  ;;  %v746_v54 = vmul.f32 %v1707_v40, %v745_v42 }
 0x42f   :  { %788 = vmatmul.mubr.bf16.vlgmr.msra.gmra.mrb[16].mxu0 %v754_v53  ;;  %829 = vmatmul.mubr.bf16.vlgmr.msra.gmra.mrb[16].mxu1 %v754_v53  ;;  %v747_v55 = vsel %vm350_vm0, %v746_v54, 0.0 }
 0x430   :  { %748 = vadd.xlane.f32.xlu1 %v747_v55  ;;  %888 = vmatpush1.bf16.msra.mxu0 %v1479_v4 }
 0x431   :  { %929 = vmatpush1.bf16.msra.mxu1 %v1484_v5  ;;  %889 = vmatprep.subr.bf16.mxu0 %v1490_v6 }
 0x432   :  { %930 = vmatprep.subr.bf16.mxu1 %v1497_v7  ;;  %919 = vmatprep.mubr.bf16.mxu0 %v1440_v1 }
 0x433   :  { %960 = vmatprep.mubr.bf16.mxu1 %v1440_v1 }
 0x434   :  { %890 = vmatpush1.bf16.msra.mxu0 %v1502_v8 }
 0x435   :  { %931 = vmatpush1.bf16.msra.mxu1 %v1508_v9  ;;  %891 = vmatprep.subr.bf16.mxu0 %v1514_v10 }
 0x436   :  { %932 = vmatprep.subr.bf16.mxu1 %v1519_v11 }
 0x438   :  { %892 = vmatpush1.bf16.msra.mxu0 %v1524_v12 }
 0x439   :  { %933 = vmatpush1.bf16.msra.mxu1 %v1529_v13  ;;  %893 = vmatprep.subr.bf16.mxu0 %v1536_v14 }
 0x43a   :  { %934 = vmatprep.subr.bf16.mxu1 %v1543_v15 }
 0x43c   :  { %894 = vmatpush1.bf16.msra.mxu0 %v1548_v16 }
 0x43d   :  { %935 = vmatpush1.bf16.msra.mxu1 %v1555_v17  ;;  %895 = vmatprep.subr.bf16.mxu0 %v1560_v18 }
 0x43e   :  { %936 = vmatprep.subr.bf16.mxu1 %v1567_v19 }
 0x440   :  { %896 = vmatpush1.bf16.msra.mxu0 %v1572_v20 }
 0x441   :  { %937 = vmatpush1.bf16.msra.mxu1 %v1577_v21  ;;  %897 = vmatprep.subr.bf16.mxu0 %v1584_v22 }
 0x442   :  { %938 = vmatprep.subr.bf16.mxu1 %v1591_v23 }
 0x444   :  { %898 = vmatpush1.bf16.msra.mxu0 %v1598_v24 }
 0x445   :  { %939 = vmatpush1.bf16.msra.mxu1 %v1603_v25  ;;  %899 = vmatprep.subr.bf16.mxu0 %v1610_v26 }
 0x446   :  { %940 = vmatprep.subr.bf16.mxu1 %v1615_v27 }
 0x448   :  { %900 = vmatpush1.bf16.msra.mxu0 %v1622_v28 }
 0x449   :  { %941 = vmatpush1.bf16.msra.mxu1 %v1627_v29  ;;  %901 = vmatprep.subr.bf16.mxu0 %v1634_v30 }
 0x44a   :  { %942 = vmatprep.subr.bf16.mxu1 %v1639_v31 }
 0x44c   :  { %902 = vmatpush1.bf16.msra.mxu0 %v1646_v32 }
 0x44d   :  { %943 = vmatpush1.bf16.msra.mxu1 %v1651_v33  ;;  %1019 = vmatprep.subr.bf16.mxu0 %v1466_v0 }
 0x44e   :  { %1060 = vmatprep.subr.bf16.mxu1 %v1473_v3 }
 0x502   :  { %v789_v47 = vpop.f32.mrb[16].mxu0  ;;  %v830_v56 = vpop.f32.mrb[16].mxu1 }
 0x503   :  { %v791_v57 = vpop.f32.mrb[17].mxu0  ;;  %v832_v58 = vpop.f32.mrb[17].mxu1 }
 0x504   :  { %v841_v59 = vcombine.low %v789_v47, %v791_v57  ;;  %v842_v60 = vcombine.low %v830_v56, %v832_v58  ;;  %v793_v61 = vpop.f32.mrb[18].mxu0  ;;  %v834_v62 = vpop.f32.mrb[18].mxu1 }
 0x505   :  { %v794_v63 = vpop.f32.mrb[19].mxu0  ;;  %v835_v2 = vpop.f32.mrb[19].mxu1 }
 0x506   :  { %v849_v34 = vrot.slane %v841_v59, %v1694_v43  ;;  %v856_v35 = vrot.slane %v842_v60, %v1694_v43 }
 0x508   :  { %v857_v39 = vcombine.low %v849_v34, %v856_v35 }
 0x50a   :  { %v859_v41 = vadd.f32 %v1324_v38, %v857_v39 }
 0x50c   :  { %v860_v44 = vmul.f32 0.5, %v859_v41  ;;  %v865_v45 = vrot.slane %v859_v41, 6 }
 0x50e   :  { %1403 = vtanh.f32 %v860_v44 }
 0x50f   :  { %1405 = vtanh.f32 %v865_v45 }
 0x518   :  { %v1404_v46 = vpop.eup %1403 }
 0x519   :  { %v862_v48 = vmul.f32 0.5, %v1404_v46  ;;  %v1406_v51 = vpop.eup %1405 }
 0x51b   :  { %v863_v49 = vadd.f32 0.5, %v862_v48 }
 0x51d   :  { %v869_v37 = vrot.slane %v863_v49, 2  ;;  %v872_v42 = vmul.f32 %v1406_v51, %v863_v49  ;;  %v875_v54 = vrot.slane %v863_v49, 4  ;;  %v1427_v49 = vld [vmem:[%s2013_s1] ss:$16 sps:$4 sm:$0xff]   ;;  %v1429_v51 = vld [vmem:[%s2013_s1 + $0x24] ss:$16 sps:$4 sm:$0xff]  }
 0x51f   :  { %v871_v52 = vmul.f32 %v869_v37, %v1841_v50  ;;  %v1428_v37 = vld [vmem:[%s2013_s1 + $0x8] ss:$16 sps:$4 sm:$0xff]  }
 0x521   :  { %v1886_v53 = vadd.f32 %v872_v42, %v871_v52  ;;  %v1430_v52 = vld [vmem:[%s2013_s1 + $0x2c] ss:$16 sps:$4 sm:$0xff]   ;;  %v1431_v42 = vld [vmem:[%s2013_s1 + $0x20] ss:$16 sps:$4 sm:$0xff]  }
 0x523   :  { %1407 = vtanh.f32 %v1886_v53 }
 0x52d   :  { %v1408_v55 = vpop.eup %1407 }
 0x52e   :  { %v877_v47 = vmul.f32 %v1408_v55, %v875_v54  ;;  %v1433_v54 = vld [vmem:[%s2013_s1 + $0x44] ss:$16 sps:$4 sm:$0xff]   ;;  %v1434_v55 = vld [vmem:[%s2013_s1 + $0x4c] ss:$16 sps:$4 sm:$0xff]  }
 0x530   :  { %v886_v56 = vpack.c.bf16 %v877_v47, %v877_v47  ;;  %v878_v57 = vmul.f32 %v1707_v40, %v877_v47  ;;  %v1436_v47 = vld [vmem:[%s2013_s1 + $0x48] ss:$16 sps:$4 sm:$0xff]  }
 0x532   :  { %920 = vmatmul.mubr.bf16.vlgmr.msra.gmra.mrb[20].mxu0 %v886_v56  ;;  %961 = vmatmul.mubr.bf16.vlgmr.msra.gmra.mrb[20].mxu1 %v886_v56  ;;  %v879_v58 = vsel %vm350_vm0, %v878_v57, 0.0  ;;  %v1437_v56 = vld [vmem:[%s2013_s1 + $0x64] ss:$16 sps:$4 sm:$0xff]   ;;  %v1438_v57 = vld [vmem:[%s2013_s1 + $0x6c] ss:$16 sps:$4 sm:$0xff]  }
 0x533   :  { %880 = vadd.xlane.f32.xlu0 %v879_v58  ;;  %1020 = vmatpush1.bf16.msra.mxu0 %v1479_v4  ;;  %v1439_v58 = vld [vmem:[%s2013_s1 + $0x60] ss:$16 sps:$4 sm:$0xff]  }
 0x534   :  { %1061 = vmatpush1.bf16.msra.mxu1 %v1484_v5  ;;  %1021 = vmatprep.subr.bf16.mxu0 %v1490_v6 }
 0x535   :  { %1062 = vmatprep.subr.bf16.mxu1 %v1497_v7  ;;  %1051 = vmatprep.mubr.bf16.mxu0 %v1440_v1 }
 0x536   :  { %1092 = vmatprep.mubr.bf16.mxu1 %v1440_v1 }
 0x537   :  { %1022 = vmatpush1.bf16.msra.mxu0 %v1502_v8 }
 0x538   :  { %1063 = vmatpush1.bf16.msra.mxu1 %v1508_v9  ;;  %1023 = vmatprep.subr.bf16.mxu0 %v1514_v10 }
 0x539   :  { %1064 = vmatprep.subr.bf16.mxu1 %v1519_v11 }
 0x53b   :  { %1024 = vmatpush1.bf16.msra.mxu0 %v1524_v12 }
 0x53c   :  { %1065 = vmatpush1.bf16.msra.mxu1 %v1529_v13  ;;  %1025 = vmatprep.subr.bf16.mxu0 %v1536_v14 }
 0x53d   :  { %1066 = vmatprep.subr.bf16.mxu1 %v1543_v15 }
 0x53f   :  { %1026 = vmatpush1.bf16.msra.mxu0 %v1548_v16 }
 0x540   :  { %1067 = vmatpush1.bf16.msra.mxu1 %v1555_v17  ;;  %1027 = vmatprep.subr.bf16.mxu0 %v1560_v18 }
 0x541   :  { %1068 = vmatprep.subr.bf16.mxu1 %v1567_v19 }
 0x543   :  { %1028 = vmatpush1.bf16.msra.mxu0 %v1572_v20 }
 0x544   :  { %1069 = vmatpush1.bf16.msra.mxu1 %v1577_v21  ;;  %1029 = vmatprep.subr.bf16.mxu0 %v1584_v22 }
 0x545   :  { %1070 = vmatprep.subr.bf16.mxu1 %v1591_v23 }
 0x547   :  { %1030 = vmatpush1.bf16.msra.mxu0 %v1598_v24 }
 0x548   :  { %1071 = vmatpush1.bf16.msra.mxu1 %v1603_v25  ;;  %1031 = vmatprep.subr.bf16.mxu0 %v1610_v26 }
 0x549   :  { %1072 = vmatprep.subr.bf16.mxu1 %v1615_v27 }
 0x54b   :  { %1032 = vmatpush1.bf16.msra.mxu0 %v1622_v28 }
 0x54c   :  { %1073 = vmatpush1.bf16.msra.mxu1 %v1627_v29  ;;  %1033 = vmatprep.subr.bf16.mxu0 %v1634_v30 }
 0x54d   :  { %1074 = vmatprep.subr.bf16.mxu1 %v1639_v31 }
 0x54f   :  { %1034 = vmatpush1.bf16.msra.mxu0 %v1646_v32 }
 0x550   :  { %1075 = vmatpush1.bf16.msra.mxu1 %v1651_v33  ;;  %1151 = vmatprep.subr.bf16.mxu0 %v1466_v0  ;;  %v1325_v0 = vld [vmem:[%s2014_s0 + $0x28] sm:$0xff] }
 0x551   :  { %1192 = vmatprep.subr.bf16.mxu1 %v1473_v3 }
 0x605   :  { %v921_v4 = vpop.f32.mrb[20].mxu0  ;;  %v962_v5 = vpop.f32.mrb[20].mxu1 }
 0x606   :  { %v923_v6 = vpop.f32.mrb[21].mxu0  ;;  %v964_v7 = vpop.f32.mrb[21].mxu1 }
 0x607   :  { %v973_v8 = vcombine.low %v921_v4, %v923_v6  ;;  %v974_v9 = vcombine.low %v962_v5, %v964_v7  ;;  %v925_v10 = vpop.f32.mrb[22].mxu0  ;;  %v966_v11 = vpop.f32.mrb[22].mxu1 }
 0x608   :  { %v926_v12 = vpop.f32.mrb[23].mxu0  ;;  %v967_v13 = vpop.f32.mrb[23].mxu1 }
 0x609   :  { %v981_v14 = vrot.slane %v973_v8, %v1694_v43  ;;  %v988_v15 = vrot.slane %v974_v9, %v1694_v43 }
 0x60b   :  { %v989_v16 = vcombine.low %v981_v14, %v988_v15 }
 0x60d   :  { %v991_v3 = vadd.f32 %v1325_v0, %v989_v16 }
 0x60f   :  { %v992_v50 = vmul.f32 0.5, %v991_v3  ;;  %v997_v59 = vrot.slane %v991_v3, 6 }
 0x611   :  { %1409 = vtanh.f32 %v992_v50 }
 0x612   :  { %1411 = vtanh.f32 %v997_v59 }
 0x61b   :  { %v1410_v60 = vpop.eup %1409 }
 0x61c   :  { %v994_v61 = vmul.f32 0.5, %v1410_v60  ;;  %v1412_v2 = vpop.eup %1411 }
 0x61e   :  { %v995_v62 = vadd.f32 0.5, %v994_v61 }
 0x620   :  { %v1001_v63 = vrot.slane %v995_v62, 2  ;;  %v1004_v35 = vmul.f32 %v1412_v2, %v995_v62  ;;  %v1007_v39 = vrot.slane %v995_v62, 4 }
 0x622   :  { %v1003_v34 = vmul.f32 %v1001_v63, %v1886_v53  ;;  %v1432_v53 = vld [vmem:[%s2013_s1 + $0x28] ss:$16 sps:$4 sm:$0xff]  }
 0x624   :  { %v1931_v38 = vadd.f32 %v1004_v35, %v1003_v34 }
 0x626   :  { %1413 = vtanh.f32 %v1931_v38 }
 0x630   :  { %v1414_v41 = vpop.eup %1413 }
 0x631   :  { %v1009_v44 = vmul.f32 %v1414_v41, %v1007_v39  ;;  %v1327_v41 = vld [vmem:[%s2014_s0 + $0x38] sm:$0xff] }
 0x633   :  { %v1018_v45 = vpack.c.bf16 %v1009_v44, %v1009_v44  ;;  %v1010_v46 = vmul.f32 %v1707_v40, %v1009_v44 }
 0x635   :  { %1052 = vmatmul.mubr.bf16.vlgmr.msra.gmra.mrb[24].mxu0 %v1018_v45  ;;  %1093 = vmatmul.mubr.bf16.vlgmr.msra.gmra.mrb[24].mxu1 %v1018_v45  ;;  %v1011_v48 = vsel %vm350_vm0, %v1010_v46, 0.0 }
 0x636   :  { %1012 = vadd.xlane.f32.xlu1 %v1011_v48  ;;  %1152 = vmatpush1.bf16.msra.mxu0 %v1427_v49 }
 0x637   :  { %1193 = vmatpush1.bf16.msra.mxu1 %v1428_v37  ;;  %1153 = vmatprep.subr.bf16.mxu0 %v1429_v51 }
 0x638   :  { %1194 = vmatprep.subr.bf16.mxu1 %v1430_v52  ;;  %1183 = vmatprep.mubr.bf16.mxu0 %v1440_v1 }
 0x639   :  { %1224 = vmatprep.mubr.bf16.mxu1 %v1440_v1  ;;  %v1435_v1 = vld [vmem:[%s2013_s1 + $0x40] ss:$16 sps:$4 sm:$0xff]  }
 0x63a   :  { %1154 = vmatpush1.bf16.msra.mxu0 %v1431_v42 }
 0x63b   :  { %1195 = vmatpush1.bf16.msra.mxu1 %v1432_v53  ;;  %1155 = vmatprep.subr.bf16.mxu0 %v1433_v54 }
 0x63c   :  { %1196 = vmatprep.subr.bf16.mxu1 %v1434_v55 }
 0x63e   :  { %1156 = vmatpush1.bf16.msra.mxu0 %v1435_v1 }
 0x63f   :  { %1197 = vmatpush1.bf16.msra.mxu1 %v1436_v47  ;;  %1157 = vmatprep.subr.bf16.mxu0 %v1437_v56 }
 0x640   :  { %1198 = vmatprep.subr.bf16.mxu1 %v1438_v57 }
 0x642   :  { %1158 = vmatpush1.bf16.msra.mxu0 %v1439_v58  ;;  %v353_v58 = vpop.xlane.xlu0 %352 }
 0x643   :  { %1199 = vmatpush1.bf16.msra.mxu1 %v1555_v17  ;;  %1159 = vmatprep.subr.bf16.mxu0 %v1560_v18 }
 0x644   :  { %1200 = vmatprep.subr.bf16.mxu1 %v1567_v19 }
 0x646   :  { %1160 = vmatpush1.bf16.msra.mxu0 %v1572_v20 }
 0x647   :  { %1201 = vmatpush1.bf16.msra.mxu1 %v1577_v21  ;;  %1161 = vmatprep.subr.bf16.mxu0 %v1584_v22 }
 0x648   :  { %1202 = vmatprep.subr.bf16.mxu1 %v1591_v23 }
 0x64a   :  { %1162 = vmatpush1.bf16.msra.mxu0 %v1598_v24 }
 0x64b   :  { %1203 = vmatpush1.bf16.msra.mxu1 %v1603_v25  ;;  %1163 = vmatprep.subr.bf16.mxu0 %v1610_v26 }
 0x64c   :  { %1204 = vmatprep.subr.bf16.mxu1 %v1615_v27 }
 0x64e   :  { %1164 = vmatpush1.bf16.msra.mxu0 %v1622_v28 }
 0x64f   :  { %1205 = vmatpush1.bf16.msra.mxu1 %v1627_v29  ;;  %1165 = vmatprep.subr.bf16.mxu0 %v1634_v30  ;;  %v1326_v29 = vld [vmem:[%s2014_s0 + $0x30] sm:$0xff] }
 0x650   :  { %1206 = vmatprep.subr.bf16.mxu1 %v1639_v31 }
 0x652   :  { %1166 = vmatpush1.bf16.msra.mxu0 %v1646_v32 }
 0x653   :  { %1207 = vmatpush1.bf16.msra.mxu1 %v1651_v33 }
 0x708   :  { %v1053_v17 = vpop.f32.mrb[24].mxu0  ;;  %v1094_v18 = vpop.f32.mrb[24].mxu1 }
 0x709   :  { %v1055_v19 = vpop.f32.mrb[25].mxu0  ;;  %v1096_v20 = vpop.f32.mrb[25].mxu1 }
 0x70a   :  { %v1105_v21 = vcombine.low %v1053_v17, %v1055_v19  ;;  %v1106_v22 = vcombine.low %v1094_v18, %v1096_v20  ;;  %v1057_v23 = vpop.f32.mrb[26].mxu0  ;;  %v1098_v24 = vpop.f32.mrb[26].mxu1  ;;  %v23_v17 = vand.u32 127, %v22_v36 }
 0x70b   :  { %v1058_v25 = vpop.f32.mrb[27].mxu0  ;;  %v1099_v26 = vpop.f32.mrb[27].mxu1 }
 0x70c   :  { %v1113_v27 = vrot.slane %v1105_v21, %v1694_v43  ;;  %v1120_v28 = vrot.slane %v1106_v22, %v1694_v43  ;;  %v617_v18 = vpop.xlane.xlu1 %616  ;;  %v485_v19 = vpop.xlane.xlu0 %484  ;;  %vm354_vm1 = vcmp.eq.s32.totalorder %v23_v17, 0  ;;  %vm486_vm2 = vcmp.eq.s32.totalorder %v23_v17, 1 }
 0x70d   :  { %vm618_vm3 = vcmp.eq.s32.totalorder %v23_v17, 2  ;;  %v355_v22 = vsel %vm354_vm1, %v353_v58, 0.0  ;;  %vm750_vm4 = vcmp.eq.s32.totalorder %v23_v17, 3  ;;  %vm882_vm5 = vcmp.eq.s32.totalorder %v23_v17, 4 }
 0x70e   :  { %v1121_v30 = vcombine.low %v1113_v27, %v1120_v28  ;;  %v487_v23 = vsel %vm486_vm2, %v485_v19, %v355_v22  ;;  %vm1014_vm6 = vcmp.eq.s32.totalorder %v23_v17, 5  ;;  %vm1146_vm7 = vcmp.eq.s32.totalorder %v23_v17, 6 }
 0x70f   :  { %v619_v24 = vsel %vm618_vm3, %v617_v18, %v487_v23  ;;  %vm1278_vm8 = vcmp.eq.s32.totalorder %v23_v17, 7 }
 0x710   :  { %v1123_v31 = vadd.f32 %v1326_v29, %v1121_v30  ;;  %v749_v20 = vpop.xlane.xlu1 %748  ;;  %v881_v21 = vpop.xlane.xlu0 %880 }
 0x711   :  { %v751_v25 = vsel %vm750_vm4, %v749_v20, %v619_v24 }
 0x712   :  { %v1124_v32 = vmul.f32 0.5, %v1123_v31  ;;  %v1129_v33 = vrot.slane %v1123_v31, 6  ;;  %v883_v27 = vsel %vm882_vm5, %v881_v21, %v751_v25 }
 0x714   :  { %1415 = vtanh.f32 %v1124_v32 }
 0x715   :  { %1417 = vtanh.f32 %v1129_v33 }
 0x71e   :  { %v1416_v4 = vpop.eup %1415 }
 0x71f   :  { %v1126_v5 = vmul.f32 0.5, %v1416_v4  ;;  %v1418_v8 = vpop.eup %1417 }
 0x721   :  { %v1127_v6 = vadd.f32 0.5, %v1126_v5 }
 0x723   :  { %v1133_v7 = vrot.slane %v1127_v6, 2  ;;  %v1136_v10 = vmul.f32 %v1418_v8, %v1127_v6  ;;  %v1139_v12 = vrot.slane %v1127_v6, 4 }
 0x725   :  { %v1135_v9 = vmul.f32 %v1133_v7, %v1931_v38 }
 0x727   :  { %v1137_v11 = vadd.f32 %v1136_v10, %v1135_v9 }
 0x729   :  { %1419 = vtanh.f32 %v1137_v11 }
 0x733   :  { %v1420_v13 = vpop.eup %1419 }
 0x734   :  { %v1141_v14 = vmul.f32 %v1420_v13, %v1139_v12 }
 0x736   :  { %v1150_v15 = vpack.c.bf16 %v1141_v14, %v1141_v14  ;;  %v1142_v0 = vmul.f32 %v1707_v40, %v1141_v14 }
 0x738   :  { %1184 = vmatmul.mubr.bf16.vlgmr.msra.gmra.mrb[28].mxu0 %v1150_v15  ;;  %1225 = vmatmul.mubr.bf16.vlgmr.msra.gmra.mrb[28].mxu1 %v1150_v15  ;;  %v1143_v16 = vsel %vm350_vm0, %v1142_v0, 0.0 }
 0x739   :  { %1144 = vadd.xlane.f32.xlu0 %v1143_v16 }
 0x7c6   :  { %v1145_v26 = vpop.xlane.xlu0 %1144 }
 0x80b   :  { %v1185_v3 = vpop.f32.mrb[28].mxu0  ;;  %v1226_v50 = vpop.f32.mrb[28].mxu1 }
 0x80c   :  { %v1187_v59 = vpop.f32.mrb[29].mxu0  ;;  %v1228_v60 = vpop.f32.mrb[29].mxu1 }
 0x80d   :  { %v1237_v61 = vcombine.low %v1185_v3, %v1187_v59  ;;  %v1238_v62 = vcombine.low %v1226_v50, %v1228_v60  ;;  %v1189_v63 = vpop.f32.mrb[30].mxu0  ;;  %v1230_v2 = vpop.f32.mrb[30].mxu1 }
 0x80e   :  { %v1190_v34 = vpop.f32.mrb[31].mxu0  ;;  %v1231_v35 = vpop.f32.mrb[31].mxu1 }
 0x80f   :  { %v1245_v38 = vrot.slane %v1237_v61, %v1694_v43  ;;  %v1252_v39 = vrot.slane %v1238_v62, %v1694_v43 }
 0x811   :  { %v1253_v44 = vcombine.low %v1245_v38, %v1252_v39 }
 0x813   :  { %v1255_v45 = vadd.f32 %v1327_v41, %v1253_v44 }
 0x815   :  { %v1256_v46 = vmul.f32 0.5, %v1255_v45  ;;  %v1261_v48 = vrot.slane %v1255_v45, 6 }
 0x817   :  { %1421 = vtanh.f32 %v1256_v46 }
 0x818   :  { %1423 = vtanh.f32 %v1261_v48 }
 0x821   :  { %v1422_v49 = vpop.eup %1421 }
 0x822   :  { %v1258_v37 = vmul.f32 0.5, %v1422_v49  ;;  %v1424_v42 = vpop.eup %1423 }
 0x824   :  { %v1259_v51 = vadd.f32 0.5, %v1258_v37 }
 0x826   :  { %v1265_v52 = vrot.slane %v1259_v51, 2  ;;  %v1268_v54 = vmul.f32 %v1424_v42, %v1259_v51  ;;  %v1271_v43 = vrot.slane %v1259_v51, 4 }
 0x828   :  { %v1267_v53 = vmul.f32 %v1265_v52, %v1137_v11 }
 0x82a   :  { %v1269_v55 = vadd.f32 %v1268_v54, %v1267_v53 }
 0x82c   :  { %1425 = vtanh.f32 %v1269_v55  ;;  %1283 = vst [vmem:[#allocation3] sm:$0x3] %v1269_v55 }
 0x836   :  { %v1426_v1 = vpop.eup %1425 }
 0x837   :  { %v1273_v47 = vmul.f32 %v1426_v1, %v1271_v43 }
 0x839   :  { %v1274_v56 = vmul.f32 %v1707_v40, %v1273_v47  ;;  %1282 = vst [vmem:[#allocation2] sm:$0x3] %v1273_v47  ;;  %v1013_v40 = vpop.xlane.xlu1 %1012 }
 0x83a   :  { %v1015_v36 = vsel %vm1014_vm6, %v1013_v40, %v883_v27 }
 0x83b   :  { %v1275_v57 = vsel %vm350_vm0, %v1274_v56, 0.0  ;;  %v1147_v28 = vsel %vm1146_vm7, %v1145_v26, %v1015_v36 }
 0x83c   :  { %1276 = vadd.xlane.f32.xlu1 %v1275_v57 }
 0x8c9   :  { %v1277_v29 = vpop.xlane.xlu1 %1276 }
 0x8ca   :  { %v1279_v30 = vsel %vm1278_vm8, %v1277_v29, %v1147_v28 }
 0x8cb   :  { %1281 = vst.msk [vmem:[%s2016_s3] sm:$0x3] %vm1280_vm9, %v1279_v30 }

</bundles_post_ra>
